<compile_context>
chip_gen: v7x
topology: tpu7x:2x2x1
jax: 0.10.0
libtpu: 0.0.40
codegen_flags: <defaults>
</compile_context>

<pallas_src>
from functools import partial

import numpy as np
import jax
import jax.numpy as jnp
from jax import lax
from jax.experimental import pallas as pl
from jax.experimental.pallas import tpu as pltpu


def greedy_merging_kernel(k_ref, v_ref, out_ref, gs_ref, *, n, n_out, r):
    bt = k_ref.shape[0]            # batch tile: independent merge chains per grid step
    cdt = k_ref.dtype              # MXU compute dtype == input dtype (bf16 stays bf16)

    k = k_ref[...]                 # (bt, n, d)
    v = v_ref[...]                 # (bt, n, d)

    # ---- row-normalized keys & pairwise cosine scores (MXU, f32 accumulation) ----------
    kf = k.astype(jnp.float32)
    sumsq = jnp.sum(kf * kf, axis=-1, keepdims=True)
    inv_norm = lax.rsqrt(jnp.maximum(sumsq, jnp.float32(1e-30)))   # guard all-zero rows only
    kn = (kf * inv_norm).astype(cdt)
    scores = jnp.einsum('bnd,bmd->bnm', kn, kn,
                        preferred_element_type=jnp.float32)        # (bt, n, n)

    # ---- loop-invariant constants (hoisted: JAX does not CSE broadcast_in_dim) ----------
    row_i = lax.broadcasted_iota(jnp.int32, (bt, n, n), 1)
    col_j = lax.broadcasted_iota(jnp.int32, (bt, n, n), 2)
    neg_inf = jnp.float32(-1e30)
    big_idx = jnp.int32(n)
    neg_one = jnp.int32(-1)
    scores_ut = jnp.where(row_i < col_j, scores, neg_inf)          # strict upper triangle only

    sub_iota = lax.broadcasted_iota(jnp.int32, (bt, n, 1), 1)      # token idx on sublane axis
    lane_iota = lax.broadcasted_iota(jnp.int32, (bt, 1, n), 2)     # token idx on lane axis

    # Group id of every token, kept lane-major (bt,1,n) AND sublane-major (bt,n,1) so the
    # merge loop never needs a transpose.
    gid_row0 = lane_iota
    gid_col0 = sub_iota

    def merge_step(_, carry):
        gid_row, gid_col = carry
        # edges whose endpoints are still in different groups (implicit broadcast compare)
        masked = jnp.where(gid_col != gid_row, scores_ut, neg_inf)             # (bt, n, n)
        rowmax = jnp.max(masked, axis=-1, keepdims=True)                       # (bt, n, 1)
        # per-row first column attaining the row max (row-major tie-break, as in torch walk)
        colarg = jnp.min(jnp.where(masked == rowmax, col_j, big_idx),
                         axis=-1, keepdims=True)                               # (bt, n, 1)
        m = jnp.max(rowmax, axis=-2, keepdims=True)                            # (bt, 1, 1)
        # winning edge (i0, j0): first row attaining the global max, then its first column
        i0 = jnp.min(jnp.where(rowmax == m, sub_iota, big_idx),
                     axis=-2, keepdims=True)                                   # (bt, 1, 1)
        row_hit = sub_iota == i0                                               # (bt, n, 1)
        j0 = jnp.max(jnp.where(row_hit, colarg, neg_one), axis=-2, keepdims=True)
        # scalar decode of the two group ids via tiny (n,1)/(1,n) masked reduces
        gi = jnp.max(jnp.where(row_hit, gid_col, neg_one), axis=-2, keepdims=True)
        gj = jnp.max(jnp.where(lane_iota == j0, gid_row, neg_one),
                     axis=-1, keepdims=True)                                   # (bt, 1, 1)
        # merge group gi into group gj
        gid_row = jnp.where(gid_row == gi, gj, gid_row)
        gid_col = jnp.where(gid_col == gi, gj, gid_col)
        return gid_row, gid_col

    gid_row, gid_col = lax.fori_loop(0, r, merge_step, (gid_row0, gid_col0),
                                     unroll=(r <= 16))

    # ---- build the (n_out, n) averaging matrix and reduce on the MXU --------------------
    same = (gid_col == gid_row).astype(jnp.float32)                            # (bt, n, n)
    tok_size = jnp.sum(same, axis=-2, keepdims=True)                           # (bt, 1, n)

    g_iota = lax.broadcasted_iota(jnp.int32, (bt, n, n), 1)                    # candidate gid
    member = (g_iota == gid_row).astype(jnp.float32)                           # member[g, t]
    surv = (jnp.sum(member, axis=-1, keepdims=True) > 0.0).astype(jnp.float32) # (bt, n, 1)
    leq = (g_iota <= gid_row).astype(jnp.float32)
    tok_pos = (jnp.sum(surv * leq, axis=-2, keepdims=True) - 1.0
               ).astype(jnp.int32)                                             # (bt, 1, n)

    o_iota = lax.broadcasted_iota(jnp.int32, (bt, n_out, n), 1)
    assign = (o_iota == tok_pos).astype(jnp.float32)                           # (bt, n_out, n)

    inv_size = 1.0 / tok_size                                                  # (bt, 1, n)
    # NOTE: for bf16 inputs merge_w rounds 1/size to bf16 (exact for power-of-two sizes);
    # with f32 inputs (as in the test) this path is exact.
    merge_w = (assign * inv_size).astype(cdt)                                  # mean weights
    out = jnp.einsum('bot,btd->bod', merge_w, v,
                     preferred_element_type=jnp.float32)                       # (bt, n_out, d)
    sizes = jnp.sum(assign, axis=-1, keepdims=True)                            # (bt, n_out, 1)

    out_ref[...] = out.astype(out_ref.dtype)
    gs_ref[...] = sizes.astype(gs_ref.dtype)


def _pick_batch_tile(b, max_tile=8):
    """Largest divisor of b (<= max_tile) that still leaves a grid length >= 2 when possible."""
    divs = [t for t in range(1, min(b, max_tile) + 1) if b % t == 0]
    two_core = [t for t in divs if b // t >= 2]
    return max(two_core) if two_core else max(divs)


def greedy_merging_pallas(k, v, n_out, *, batch_tile=None):
    """k, v: (b, n, d).  Returns (out: (b, n_out, d), group_sizes: (b, n_out))."""
    b, n, d = k.shape
    assert v.shape == (b, n, d)
    assert 0 < n_out <= n
    r = n - n_out
    bt = _pick_batch_tile(b) if batch_tile is None else batch_tile
    assert b % bt == 0

    itemsize = jnp.dtype(k.dtype).itemsize
    # VMEM budget: double-buffered k/v input blocks + output blocks + (bt,n,n) f32 temporaries.
    working = (2 * 2 * bt * n * d * itemsize
               + 2 * bt * n_out * (d * itemsize + 4)
               + 10 * bt * n * n * 4
               + 3 * bt * n * d * 4)
    vmem_limit = int(min(64 * 1024 * 1024, max(16 * 1024 * 1024, 4 * working)))

    cost = pl.CostEstimate(
        flops=2 * b * n * d * (n + n_out),
        transcendentals=b * n,
        bytes_accessed=(2 * b * n * d + b * n_out * d) * itemsize + b * n_out * 4,
    )

    kernel = partial(greedy_merging_kernel, n=n, n_out=n_out, r=r)
    out, gs = pl.pallas_call(
        kernel,
        out_shape=(
            jax.ShapeDtypeStruct((b, n_out, d), k.dtype),
            jax.ShapeDtypeStruct((b, n_out, 1), jnp.float32),
        ),
        grid_spec=pltpu.PrefetchScalarGridSpec(
            num_scalar_prefetch=0,
            grid=(b // bt,),
            in_specs=[
                pl.BlockSpec((bt, n, d), lambda i: (i, 0, 0)),       # k
                pl.BlockSpec((bt, n, d), lambda i: (i, 0, 0)),       # v
            ],
            out_specs=[
                pl.BlockSpec((bt, n_out, d), lambda i: (i, 0, 0)),
                pl.BlockSpec((bt, n_out, 1), lambda i: (i, 0, 0)),
            ],
        ),
        compiler_params=pltpu.CompilerParams(
            dimension_semantics=("parallel",),
            vmem_limit_bytes=vmem_limit,
        ),
        cost_estimate=cost,
    )(k, v)
    return out, gs[..., 0]


def greedy_merging_reference(k, v, n_out):
    """Pure numpy port of the torch GreedyMerging.forward semantics."""
    k = np.asarray(k, dtype=np.float32)
    v = np.asarray(v, dtype=np.float32)
    b, n, d = k.shape
    r = n - n_out
    kn = k / np.linalg.norm(k, axis=-1, keepdims=True)
    outs, sizes = [], []
    for bi in range(b):
        S = kn[bi] @ kn[bi].T
        gid = np.arange(n)
        for _ in range(r):
            best, bi0, bj0 = -np.inf, -1, -1
            for i0 in range(n):
                for j0 in range(i0 + 1, n):
                    if gid[i0] != gid[j0] and S[i0, j0] > best:
                        best, bi0, bj0 = S[i0, j0], i0, j0
            gi, gj = gid[bi0], gid[bj0]
            gid[gid == gi] = gj
        surviving = sorted(set(gid.tolist()))
        W = np.zeros((n_out, n), dtype=np.float32)
        gs = np.zeros((n_out,), dtype=np.float32)
        for o, g in enumerate(surviving):
            members = gid == g
            gs[o] = members.sum()
            W[o, members] = 1.0 / members.sum()
        outs.append(W @ v[bi])
        sizes.append(gs)
    return np.stack(outs), np.stack(sizes)


if __name__ == "__main__":
    n, d, n_out = 16, 32, 8          # n_tokens = 16 -> n_out = 8 (r = 8 merges)

    key = jax.random.PRNGKey(0)
    # b=2 exercises batch_tile=1 (grid=2); b=8 exercises batch_tile=4 (grid=2, 4 chains/step).
    for b in (2, 8):
        key, k_key, v_key = jax.random.split(key, 3)
        k = jax.random.normal(k_key, (b, n, d), dtype=jnp.float32)
        v = jax.random.normal(v_key, (b, n, d), dtype=jnp.float32)

        out, group_sizes = greedy_merging_pallas(k, v, n_out)
        jax.block_until_ready((out, group_sizes))

        out_np, gs_np = greedy_merging_reference(k, v, n_out)
        assert out.shape == (b, n_out, d)
        assert group_sizes.shape == (b, n_out)
        assert np.allclose(np.asarray(group_sizes), gs_np), f"group_sizes mismatch (b={b})"
        assert np.allclose(np.asarray(out), out_np, atol=1e-4, rtol=1e-4), f"out mismatch (b={b})"

    print("KERNEL_OK")
</pallas_src>

<mosaic_0001>
module attributes {stable_mosaic.version = 11 : i64} {
  func.func @greedy_merging_kernel(%arg0: i32, %arg1: memref<1x16x32xf32, #tpu.memory_space<vmem>>, %arg2: memref<1x16x32xf32, #tpu.memory_space<vmem>>, %arg3: memref<1x8x32xf32, #tpu.memory_space<vmem>>, %arg4: memref<1x8x1xf32, #tpu.memory_space<vmem>>) attributes {dimension_semantics = [#tpu.dimension_semantics<parallel>], iteration_bounds = array<i64: 2>, scalar_prefetch = 0 : i64, scratch_operands = 0 : i64, tpu.core_type = #tpu.core_type<tc>, window_params = [{transform_indices = @transform_0, window_bounds = array<i64: 1, 16, 32>}, {transform_indices = @transform_1, window_bounds = array<i64: 1, 16, 32>}, {transform_indices = @transform_2, window_bounds = array<i64: 1, 8, 32>}, {transform_indices = @transform_3, window_bounds = array<i64: 1, 8, 1>}]} {
    %c0 = arith.constant 0 : index
    %c0_0 = arith.constant 0 : index
    %c0_1 = arith.constant 0 : index
    %0 = vector.load %arg1[%c0, %c0_0, %c0_1] : memref<1x16x32xf32, #tpu.memory_space<vmem>>, vector<1x16x32xf32>
    %c0_2 = arith.constant 0 : index
    %c0_3 = arith.constant 0 : index
    %c0_4 = arith.constant 0 : index
    %1 = vector.load %arg2[%c0_2, %c0_3, %c0_4] : memref<1x16x32xf32, #tpu.memory_space<vmem>>, vector<1x16x32xf32>
    %2 = arith.mulf %0, %0 : vector<1x16x32xf32>
    %cst = arith.constant dense<0.000000e+00> : vector<1x16xf32>
    %3 = vector.multi_reduction <add>, %2, %cst [2] : vector<1x16x32xf32> to vector<1x16xf32>
    %4 = vector.shape_cast %3 : vector<1x16xf32> to vector<1x16x1xf32>
    %cst_5 = arith.constant 1.000000e-30 : f32
    %5 = vector.broadcast %cst_5 : f32 to vector<1x16x1xf32>
    %6 = arith.maximumf %4, %5 : vector<1x16x1xf32>
    %7 = math.rsqrt %6 : vector<1x16x1xf32>
    %8 = vector.broadcast %7 : vector<1x16x1xf32> to vector<1x16x32xf32>
    %9 = arith.mulf %0, %8 : vector<1x16x32xf32>
    "tpu.trace_start"() <{level = 10 : i32, message = "bnd,bmd->bnm"}> : () -> ()
    %cst_6 = arith.constant dense<0.000000e+00> : vector<1x16x16xf32>
    %10 = tpu.matmul %9, %9, %cst_6 {dimension_numbers = #tpu.dot_dimension_numbers<[2], [2], [1], [1], [0, 0, 0, 1, 1, 1], [0], [0]>} : vector<1x16x32xf32>, vector<1x16x32xf32>, vector<1x16x16xf32> -> vector<1x16x16xf32>
    "tpu.trace_stop"() : () -> ()
    %11 = tpu.iota {dimensions = array<i32: 1>} : vector<1x16x16xi32>
    %12 = tpu.iota {dimensions = array<i32: 2>} : vector<1x16x16xi32>
    %13 = arith.cmpi slt, %11, %12 : vector<1x16x16xi32>
    %cst_7 = arith.constant -1.000000e+30 : f32
    %14 = vector.broadcast %cst_7 : f32 to vector<1x16x16xf32>
    %15 = arith.select %13, %10, %14 : vector<1x16x16xi1>, vector<1x16x16xf32>
    %16 = tpu.iota {dimensions = array<i32: 1>} : vector<1x16x1xi32>
    %17 = tpu.iota {dimensions = array<i32: 2>} : vector<1x1x16xi32>
    %cst_8 = arith.constant -1.000000e+30 : f32
    %c16_i32 = arith.constant 16 : i32
    %c-1_i32 = arith.constant -1 : i32
    %c0_i32 = arith.constant 0 : i32
    %18 = vector.broadcast %16 : vector<1x16x1xi32> to vector<1x16x16xi32>
    %19 = vector.broadcast %17 : vector<1x1x16xi32> to vector<1x16x16xi32>
    %20 = arith.cmpi ne, %18, %19 : vector<1x16x16xi32>
    %21 = vector.broadcast %cst_8 : f32 to vector<1x16x16xf32>
    %22 = arith.select %20, %15, %21 : vector<1x16x16xi1>, vector<1x16x16xf32>
    %cst_9 = arith.constant dense<0xFF800000> : vector<1x16xf32>
    %23 = vector.multi_reduction <maximumf>, %22, %cst_9 [2] : vector<1x16x16xf32> to vector<1x16xf32>
    %24 = vector.shape_cast %23 : vector<1x16xf32> to vector<1x16x1xf32>
    %25 = vector.broadcast %24 : vector<1x16x1xf32> to vector<1x16x16xf32>
    %26 = arith.cmpf oeq, %22, %25 : vector<1x16x16xf32>
    %27 = vector.broadcast %c16_i32 : i32 to vector<1x16x16xi32>
    %28 = arith.select %26, %12, %27 : vector<1x16x16xi1>, vector<1x16x16xi32>
    %cst_10 = arith.constant dense<2147483647> : vector<1x16xi32>
    %29 = vector.multi_reduction <minsi>, %28, %cst_10 [2] : vector<1x16x16xi32> to vector<1x16xi32>
    %30 = vector.shape_cast %29 : vector<1x16xi32> to vector<1x16x1xi32>
    %cst_11 = arith.constant dense<0xFF800000> : vector<1x1xf32>
    %31 = vector.multi_reduction <maximumf>, %24, %cst_11 [1] : vector<1x16x1xf32> to vector<1x1xf32>
    %32 = vector.shape_cast %31 : vector<1x1xf32> to vector<1x1x1xf32>
    %33 = vector.broadcast %32 : vector<1x1x1xf32> to vector<1x16x1xf32>
    %34 = arith.cmpf oeq, %24, %33 : vector<1x16x1xf32>
    %35 = vector.broadcast %c16_i32 : i32 to vector<1x16x1xi32>
    %36 = arith.select %34, %16, %35 : vector<1x16x1xi1>, vector<1x16x1xi32>
    %cst_12 = arith.constant dense<2147483647> : vector<1x1xi32>
    %37 = vector.multi_reduction <minsi>, %36, %cst_12 [1] : vector<1x16x1xi32> to vector<1x1xi32>
    %38 = vector.shape_cast %37 : vector<1x1xi32> to vector<1x1x1xi32>
    %39 = vector.broadcast %38 : vector<1x1x1xi32> to vector<1x16x1xi32>
    %40 = arith.cmpi eq, %16, %39 : vector<1x16x1xi32>
    %41 = vector.broadcast %c-1_i32 : i32 to vector<1x16x1xi32>
    %42 = arith.select %40, %30, %41 : vector<1x16x1xi1>, vector<1x16x1xi32>
    %cst_13 = arith.constant dense<-2147483648> : vector<1x1xi32>
    %43 = vector.multi_reduction <maxsi>, %42, %cst_13 [1] : vector<1x16x1xi32> to vector<1x1xi32>
    %44 = vector.shape_cast %43 : vector<1x1xi32> to vector<1x1x1xi32>
    %45 = vector.broadcast %c-1_i32 : i32 to vector<1x16x1xi32>
    %46 = arith.select %40, %16, %45 : vector<1x16x1xi1>, vector<1x16x1xi32>
    %cst_14 = arith.constant dense<-2147483648> : vector<1x1xi32>
    %47 = vector.multi_reduction <maxsi>, %46, %cst_14 [1] : vector<1x16x1xi32> to vector<1x1xi32>
    %48 = vector.shape_cast %47 : vector<1x1xi32> to vector<1x1x1xi32>
    %49 = vector.broadcast %44 : vector<1x1x1xi32> to vector<1x1x16xi32>
    %50 = arith.cmpi eq, %17, %49 : vector<1x1x16xi32>
    %51 = vector.broadcast %c-1_i32 : i32 to vector<1x1x16xi32>
    %52 = arith.select %50, %17, %51 : vector<1x1x16xi1>, vector<1x1x16xi32>
    %cst_15 = arith.constant dense<-2147483648> : vector<1x1xi32>
    %53 = vector.multi_reduction <maxsi>, %52, %cst_15 [2] : vector<1x1x16xi32> to vector<1x1xi32>
    %54 = vector.shape_cast %53 : vector<1x1xi32> to vector<1x1x1xi32>
    %55 = vector.broadcast %48 : vector<1x1x1xi32> to vector<1x1x16xi32>
    %56 = arith.cmpi eq, %17, %55 : vector<1x1x16xi32>
    %57 = vector.shape_cast %54 : vector<1x1x1xi32> to vector<1x1x1xi32>
    %58 = vector.broadcast %57 : vector<1x1x1xi32> to vector<1x1x16xi32>
    %59 = arith.select %56, %58, %17 : vector<1x1x16xi1>, vector<1x1x16xi32>
    %60 = vector.broadcast %48 : vector<1x1x1xi32> to vector<1x16x1xi32>
    %61 = arith.cmpi eq, %16, %60 : vector<1x16x1xi32>
    %62 = vector.shape_cast %54 : vector<1x1x1xi32> to vector<1x1x1xi32>
    %63 = vector.broadcast %62 : vector<1x1x1xi32> to vector<1x16x1xi32>
    %64 = arith.select %61, %63, %16 : vector<1x16x1xi1>, vector<1x16x1xi32>
    %c1_i32 = arith.constant 1 : i32
    %65 = vector.broadcast %64 : vector<1x16x1xi32> to vector<1x16x16xi32>
    %66 = vector.broadcast %59 : vector<1x1x16xi32> to vector<1x16x16xi32>
    %67 = arith.cmpi ne, %65, %66 : vector<1x16x16xi32>
    %68 = vector.broadcast %cst_8 : f32 to vector<1x16x16xf32>
    %69 = arith.select %67, %15, %68 : vector<1x16x16xi1>, vector<1x16x16xf32>
    %cst_16 = arith.constant dense<0xFF800000> : vector<1x16xf32>
    %70 = vector.multi_reduction <maximumf>, %69, %cst_16 [2] : vector<1x16x16xf32> to vector<1x16xf32>
    %71 = vector.shape_cast %70 : vector<1x16xf32> to vector<1x16x1xf32>
    %72 = vector.broadcast %71 : vector<1x16x1xf32> to vector<1x16x16xf32>
    %73 = arith.cmpf oeq, %69, %72 : vector<1x16x16xf32>
    %74 = vector.broadcast %c16_i32 : i32 to vector<1x16x16xi32>
    %75 = arith.select %73, %12, %74 : vector<1x16x16xi1>, vector<1x16x16xi32>
    %cst_17 = arith.constant dense<2147483647> : vector<1x16xi32>
    %76 = vector.multi_reduction <minsi>, %75, %cst_17 [2] : vector<1x16x16xi32> to vector<1x16xi32>
    %77 = vector.shape_cast %76 : vector<1x16xi32> to vector<1x16x1xi32>
    %cst_18 = arith.constant dense<0xFF800000> : vector<1x1xf32>
    %78 = vector.multi_reduction <maximumf>, %71, %cst_18 [1] : vector<1x16x1xf32> to vector<1x1xf32>
    %79 = vector.shape_cast %78 : vector<1x1xf32> to vector<1x1x1xf32>
    %80 = vector.broadcast %79 : vector<1x1x1xf32> to vector<1x16x1xf32>
    %81 = arith.cmpf oeq, %71, %80 : vector<1x16x1xf32>
    %82 = vector.broadcast %c16_i32 : i32 to vector<1x16x1xi32>
    %83 = arith.select %81, %16, %82 : vector<1x16x1xi1>, vector<1x16x1xi32>
    %cst_19 = arith.constant dense<2147483647> : vector<1x1xi32>
    %84 = vector.multi_reduction <minsi>, %83, %cst_19 [1] : vector<1x16x1xi32> to vector<1x1xi32>
    %85 = vector.shape_cast %84 : vector<1x1xi32> to vector<1x1x1xi32>
    %86 = vector.broadcast %85 : vector<1x1x1xi32> to vector<1x16x1xi32>
    %87 = arith.cmpi eq, %16, %86 : vector<1x16x1xi32>
    %88 = vector.broadcast %c-1_i32 : i32 to vector<1x16x1xi32>
    %89 = arith.select %87, %77, %88 : vector<1x16x1xi1>, vector<1x16x1xi32>
    %cst_20 = arith.constant dense<-2147483648> : vector<1x1xi32>
    %90 = vector.multi_reduction <maxsi>, %89, %cst_20 [1] : vector<1x16x1xi32> to vector<1x1xi32>
    %91 = vector.shape_cast %90 : vector<1x1xi32> to vector<1x1x1xi32>
    %92 = vector.broadcast %c-1_i32 : i32 to vector<1x16x1xi32>
    %93 = arith.select %87, %64, %92 : vector<1x16x1xi1>, vector<1x16x1xi32>
    %cst_21 = arith.constant dense<-2147483648> : vector<1x1xi32>
    %94 = vector.multi_reduction <maxsi>, %93, %cst_21 [1] : vector<1x16x1xi32> to vector<1x1xi32>
    %95 = vector.shape_cast %94 : vector<1x1xi32> to vector<1x1x1xi32>
    %96 = vector.broadcast %91 : vector<1x1x1xi32> to vector<1x1x16xi32>
    %97 = arith.cmpi eq, %17, %96 : vector<1x1x16xi32>
    %98 = vector.broadcast %c-1_i32 : i32 to vector<1x1x16xi32>
    %99 = arith.select %97, %59, %98 : vector<1x1x16xi1>, vector<1x1x16xi32>
    %cst_22 = arith.constant dense<-2147483648> : vector<1x1xi32>
    %100 = vector.multi_reduction <maxsi>, %99, %cst_22 [2] : vector<1x1x16xi32> to vector<1x1xi32>
    %101 = vector.shape_cast %100 : vector<1x1xi32> to vector<1x1x1xi32>
    %102 = vector.broadcast %95 : vector<1x1x1xi32> to vector<1x1x16xi32>
    %103 = arith.cmpi eq, %59, %102 : vector<1x1x16xi32>
    %104 = vector.shape_cast %101 : vector<1x1x1xi32> to vector<1x1x1xi32>
    %105 = vector.broadcast %104 : vector<1x1x1xi32> to vector<1x1x16xi32>
    %106 = arith.select %103, %105, %59 : vector<1x1x16xi1>, vector<1x1x16xi32>
    %107 = vector.broadcast %95 : vector<1x1x1xi32> to vector<1x16x1xi32>
    %108 = arith.cmpi eq, %64, %107 : vector<1x16x1xi32>
    %109 = vector.shape_cast %101 : vector<1x1x1xi32> to vector<1x1x1xi32>
    %110 = vector.broadcast %109 : vector<1x1x1xi32> to vector<1x16x1xi32>
    %111 = arith.select %108, %110, %64 : vector<1x16x1xi1>, vector<1x16x1xi32>
    %c2_i32 = arith.constant 2 : i32
    %112 = vector.broadcast %111 : vector<1x16x1xi32> to vector<1x16x16xi32>
    %113 = vector.broadcast %106 : vector<1x1x16xi32> to vector<1x16x16xi32>
    %114 = arith.cmpi ne, %112, %113 : vector<1x16x16xi32>
    %115 = vector.broadcast %cst_8 : f32 to vector<1x16x16xf32>
    %116 = arith.select %114, %15, %115 : vector<1x16x16xi1>, vector<1x16x16xf32>
    %cst_23 = arith.constant dense<0xFF800000> : vector<1x16xf32>
    %117 = vector.multi_reduction <maximumf>, %116, %cst_23 [2] : vector<1x16x16xf32> to vector<1x16xf32>
    %118 = vector.shape_cast %117 : vector<1x16xf32> to vector<1x16x1xf32>
    %119 = vector.broadcast %118 : vector<1x16x1xf32> to vector<1x16x16xf32>
    %120 = arith.cmpf oeq, %116, %119 : vector<1x16x16xf32>
    %121 = vector.broadcast %c16_i32 : i32 to vector<1x16x16xi32>
    %122 = arith.select %120, %12, %121 : vector<1x16x16xi1>, vector<1x16x16xi32>
    %cst_24 = arith.constant dense<2147483647> : vector<1x16xi32>
    %123 = vector.multi_reduction <minsi>, %122, %cst_24 [2] : vector<1x16x16xi32> to vector<1x16xi32>
    %124 = vector.shape_cast %123 : vector<1x16xi32> to vector<1x16x1xi32>
    %cst_25 = arith.constant dense<0xFF800000> : vector<1x1xf32>
    %125 = vector.multi_reduction <maximumf>, %118, %cst_25 [1] : vector<1x16x1xf32> to vector<1x1xf32>
    %126 = vector.shape_cast %125 : vector<1x1xf32> to vector<1x1x1xf32>
    %127 = vector.broadcast %126 : vector<1x1x1xf32> to vector<1x16x1xf32>
    %128 = arith.cmpf oeq, %118, %127 : vector<1x16x1xf32>
    %129 = vector.broadcast %c16_i32 : i32 to vector<1x16x1xi32>
    %130 = arith.select %128, %16, %129 : vector<1x16x1xi1>, vector<1x16x1xi32>
    %cst_26 = arith.constant dense<2147483647> : vector<1x1xi32>
    %131 = vector.multi_reduction <minsi>, %130, %cst_26 [1] : vector<1x16x1xi32> to vector<1x1xi32>
    %132 = vector.shape_cast %131 : vector<1x1xi32> to vector<1x1x1xi32>
    %133 = vector.broadcast %132 : vector<1x1x1xi32> to vector<1x16x1xi32>
    %134 = arith.cmpi eq, %16, %133 : vector<1x16x1xi32>
    %135 = vector.broadcast %c-1_i32 : i32 to vector<1x16x1xi32>
    %136 = arith.select %134, %124, %135 : vector<1x16x1xi1>, vector<1x16x1xi32>
    %cst_27 = arith.constant dense<-2147483648> : vector<1x1xi32>
    %137 = vector.multi_reduction <maxsi>, %136, %cst_27 [1] : vector<1x16x1xi32> to vector<1x1xi32>
    %138 = vector.shape_cast %137 : vector<1x1xi32> to vector<1x1x1xi32>
    %139 = vector.broadcast %c-1_i32 : i32 to vector<1x16x1xi32>
    %140 = arith.select %134, %111, %139 : vector<1x16x1xi1>, vector<1x16x1xi32>
    %cst_28 = arith.constant dense<-2147483648> : vector<1x1xi32>
    %141 = vector.multi_reduction <maxsi>, %140, %cst_28 [1] : vector<1x16x1xi32> to vector<1x1xi32>
    %142 = vector.shape_cast %141 : vector<1x1xi32> to vector<1x1x1xi32>
    %143 = vector.broadcast %138 : vector<1x1x1xi32> to vector<1x1x16xi32>
    %144 = arith.cmpi eq, %17, %143 : vector<1x1x16xi32>
    %145 = vector.broadcast %c-1_i32 : i32 to vector<1x1x16xi32>
    %146 = arith.select %144, %106, %145 : vector<1x1x16xi1>, vector<1x1x16xi32>
    %cst_29 = arith.constant dense<-2147483648> : vector<1x1xi32>
    %147 = vector.multi_reduction <maxsi>, %146, %cst_29 [2] : vector<1x1x16xi32> to vector<1x1xi32>
    %148 = vector.shape_cast %147 : vector<1x1xi32> to vector<1x1x1xi32>
    %149 = vector.broadcast %142 : vector<1x1x1xi32> to vector<1x1x16xi32>
    %150 = arith.cmpi eq, %106, %149 : vector<1x1x16xi32>
    %151 = vector.shape_cast %148 : vector<1x1x1xi32> to vector<1x1x1xi32>
    %152 = vector.broadcast %151 : vector<1x1x1xi32> to vector<1x1x16xi32>
    %153 = arith.select %150, %152, %106 : vector<1x1x16xi1>, vector<1x1x16xi32>
    %154 = vector.broadcast %142 : vector<1x1x1xi32> to vector<1x16x1xi32>
    %155 = arith.cmpi eq, %111, %154 : vector<1x16x1xi32>
    %156 = vector.shape_cast %148 : vector<1x1x1xi32> to vector<1x1x1xi32>
    %157 = vector.broadcast %156 : vector<1x1x1xi32> to vector<1x16x1xi32>
    %158 = arith.select %155, %157, %111 : vector<1x16x1xi1>, vector<1x16x1xi32>
    %c3_i32 = arith.constant 3 : i32
    %159 = vector.broadcast %158 : vector<1x16x1xi32> to vector<1x16x16xi32>
    %160 = vector.broadcast %153 : vector<1x1x16xi32> to vector<1x16x16xi32>
    %161 = arith.cmpi ne, %159, %160 : vector<1x16x16xi32>
    %162 = vector.broadcast %cst_8 : f32 to vector<1x16x16xf32>
    %163 = arith.select %161, %15, %162 : vector<1x16x16xi1>, vector<1x16x16xf32>
    %cst_30 = arith.constant dense<0xFF800000> : vector<1x16xf32>
    %164 = vector.multi_reduction <maximumf>, %163, %cst_30 [2] : vector<1x16x16xf32> to vector<1x16xf32>
    %165 = vector.shape_cast %164 : vector<1x16xf32> to vector<1x16x1xf32>
    %166 = vector.broadcast %165 : vector<1x16x1xf32> to vector<1x16x16xf32>
    %167 = arith.cmpf oeq, %163, %166 : vector<1x16x16xf32>
    %168 = vector.broadcast %c16_i32 : i32 to vector<1x16x16xi32>
    %169 = arith.select %167, %12, %168 : vector<1x16x16xi1>, vector<1x16x16xi32>
    %cst_31 = arith.constant dense<2147483647> : vector<1x16xi32>
    %170 = vector.multi_reduction <minsi>, %169, %cst_31 [2] : vector<1x16x16xi32> to vector<1x16xi32>
    %171 = vector.shape_cast %170 : vector<1x16xi32> to vector<1x16x1xi32>
    %cst_32 = arith.constant dense<0xFF800000> : vector<1x1xf32>
    %172 = vector.multi_reduction <maximumf>, %165, %cst_32 [1] : vector<1x16x1xf32> to vector<1x1xf32>
    %173 = vector.shape_cast %172 : vector<1x1xf32> to vector<1x1x1xf32>
    %174 = vector.broadcast %173 : vector<1x1x1xf32> to vector<1x16x1xf32>
    %175 = arith.cmpf oeq, %165, %174 : vector<1x16x1xf32>
    %176 = vector.broadcast %c16_i32 : i32 to vector<1x16x1xi32>
    %177 = arith.select %175, %16, %176 : vector<1x16x1xi1>, vector<1x16x1xi32>
    %cst_33 = arith.constant dense<2147483647> : vector<1x1xi32>
    %178 = vector.multi_reduction <minsi>, %177, %cst_33 [1] : vector<1x16x1xi32> to vector<1x1xi32>
    %179 = vector.shape_cast %178 : vector<1x1xi32> to vector<1x1x1xi32>
    %180 = vector.broadcast %179 : vector<1x1x1xi32> to vector<1x16x1xi32>
    %181 = arith.cmpi eq, %16, %180 : vector<1x16x1xi32>
    %182 = vector.broadcast %c-1_i32 : i32 to vector<1x16x1xi32>
    %183 = arith.select %181, %171, %182 : vector<1x16x1xi1>, vector<1x16x1xi32>
    %cst_34 = arith.constant dense<-2147483648> : vector<1x1xi32>
    %184 = vector.multi_reduction <maxsi>, %183, %cst_34 [1] : vector<1x16x1xi32> to vector<1x1xi32>
    %185 = vector.shape_cast %184 : vector<1x1xi32> to vector<1x1x1xi32>
    %186 = vector.broadcast %c-1_i32 : i32 to vector<1x16x1xi32>
    %187 = arith.select %181, %158, %186 : vector<1x16x1xi1>, vector<1x16x1xi32>
    %cst_35 = arith.constant dense<-2147483648> : vector<1x1xi32>
    %188 = vector.multi_reduction <maxsi>, %187, %cst_35 [1] : vector<1x16x1xi32> to vector<1x1xi32>
    %189 = vector.shape_cast %188 : vector<1x1xi32> to vector<1x1x1xi32>
    %190 = vector.broadcast %185 : vector<1x1x1xi32> to vector<1x1x16xi32>
    %191 = arith.cmpi eq, %17, %190 : vector<1x1x16xi32>
    %192 = vector.broadcast %c-1_i32 : i32 to vector<1x1x16xi32>
    %193 = arith.select %191, %153, %192 : vector<1x1x16xi1>, vector<1x1x16xi32>
    %cst_36 = arith.constant dense<-2147483648> : vector<1x1xi32>
    %194 = vector.multi_reduction <maxsi>, %193, %cst_36 [2] : vector<1x1x16xi32> to vector<1x1xi32>
    %195 = vector.shape_cast %194 : vector<1x1xi32> to vector<1x1x1xi32>
    %196 = vector.broadcast %189 : vector<1x1x1xi32> to vector<1x1x16xi32>
    %197 = arith.cmpi eq, %153, %196 : vector<1x1x16xi32>
    %198 = vector.shape_cast %195 : vector<1x1x1xi32> to vector<1x1x1xi32>
    %199 = vector.broadcast %198 : vector<1x1x1xi32> to vector<1x1x16xi32>
    %200 = arith.select %197, %199, %153 : vector<1x1x16xi1>, vector<1x1x16xi32>
    %201 = vector.broadcast %189 : vector<1x1x1xi32> to vector<1x16x1xi32>
    %202 = arith.cmpi eq, %158, %201 : vector<1x16x1xi32>
    %203 = vector.shape_cast %195 : vector<1x1x1xi32> to vector<1x1x1xi32>
    %204 = vector.broadcast %203 : vector<1x1x1xi32> to vector<1x16x1xi32>
    %205 = arith.select %202, %204, %158 : vector<1x16x1xi1>, vector<1x16x1xi32>
    %c4_i32 = arith.constant 4 : i32
    %206 = vector.broadcast %205 : vector<1x16x1xi32> to vector<1x16x16xi32>
    %207 = vector.broadcast %200 : vector<1x1x16xi32> to vector<1x16x16xi32>
    %208 = arith.cmpi ne, %206, %207 : vector<1x16x16xi32>
    %209 = vector.broadcast %cst_8 : f32 to vector<1x16x16xf32>
    %210 = arith.select %208, %15, %209 : vector<1x16x16xi1>, vector<1x16x16xf32>
    %cst_37 = arith.constant dense<0xFF800000> : vector<1x16xf32>
    %211 = vector.multi_reduction <maximumf>, %210, %cst_37 [2] : vector<1x16x16xf32> to vector<1x16xf32>
    %212 = vector.shape_cast %211 : vector<1x16xf32> to vector<1x16x1xf32>
    %213 = vector.broadcast %212 : vector<1x16x1xf32> to vector<1x16x16xf32>
    %214 = arith.cmpf oeq, %210, %213 : vector<1x16x16xf32>
    %215 = vector.broadcast %c16_i32 : i32 to vector<1x16x16xi32>
    %216 = arith.select %214, %12, %215 : vector<1x16x16xi1>, vector<1x16x16xi32>
    %cst_38 = arith.constant dense<2147483647> : vector<1x16xi32>
    %217 = vector.multi_reduction <minsi>, %216, %cst_38 [2] : vector<1x16x16xi32> to vector<1x16xi32>
    %218 = vector.shape_cast %217 : vector<1x16xi32> to vector<1x16x1xi32>
    %cst_39 = arith.constant dense<0xFF800000> : vector<1x1xf32>
    %219 = vector.multi_reduction <maximumf>, %212, %cst_39 [1] : vector<1x16x1xf32> to vector<1x1xf32>
    %220 = vector.shape_cast %219 : vector<1x1xf32> to vector<1x1x1xf32>
    %221 = vector.broadcast %220 : vector<1x1x1xf32> to vector<1x16x1xf32>
    %222 = arith.cmpf oeq, %212, %221 : vector<1x16x1xf32>
    %223 = vector.broadcast %c16_i32 : i32 to vector<1x16x1xi32>
    %224 = arith.select %222, %16, %223 : vector<1x16x1xi1>, vector<1x16x1xi32>
    %cst_40 = arith.constant dense<2147483647> : vector<1x1xi32>
    %225 = vector.multi_reduction <minsi>, %224, %cst_40 [1] : vector<1x16x1xi32> to vector<1x1xi32>
    %226 = vector.shape_cast %225 : vector<1x1xi32> to vector<1x1x1xi32>
    %227 = vector.broadcast %226 : vector<1x1x1xi32> to vector<1x16x1xi32>
    %228 = arith.cmpi eq, %16, %227 : vector<1x16x1xi32>
    %229 = vector.broadcast %c-1_i32 : i32 to vector<1x16x1xi32>
    %230 = arith.select %228, %218, %229 : vector<1x16x1xi1>, vector<1x16x1xi32>
    %cst_41 = arith.constant dense<-2147483648> : vector<1x1xi32>
    %231 = vector.multi_reduction <maxsi>, %230, %cst_41 [1] : vector<1x16x1xi32> to vector<1x1xi32>
    %232 = vector.shape_cast %231 : vector<1x1xi32> to vector<1x1x1xi32>
    %233 = vector.broadcast %c-1_i32 : i32 to vector<1x16x1xi32>
    %234 = arith.select %228, %205, %233 : vector<1x16x1xi1>, vector<1x16x1xi32>
    %cst_42 = arith.constant dense<-2147483648> : vector<1x1xi32>
    %235 = vector.multi_reduction <maxsi>, %234, %cst_42 [1] : vector<1x16x1xi32> to vector<1x1xi32>
    %236 = vector.shape_cast %235 : vector<1x1xi32> to vector<1x1x1xi32>
    %237 = vector.broadcast %232 : vector<1x1x1xi32> to vector<1x1x16xi32>
    %238 = arith.cmpi eq, %17, %237 : vector<1x1x16xi32>
    %239 = vector.broadcast %c-1_i32 : i32 to vector<1x1x16xi32>
    %240 = arith.select %238, %200, %239 : vector<1x1x16xi1>, vector<1x1x16xi32>
    %cst_43 = arith.constant dense<-2147483648> : vector<1x1xi32>
    %241 = vector.multi_reduction <maxsi>, %240, %cst_43 [2] : vector<1x1x16xi32> to vector<1x1xi32>
    %242 = vector.shape_cast %241 : vector<1x1xi32> to vector<1x1x1xi32>
    %243 = vector.broadcast %236 : vector<1x1x1xi32> to vector<1x1x16xi32>
    %244 = arith.cmpi eq, %200, %243 : vector<1x1x16xi32>
    %245 = vector.shape_cast %242 : vector<1x1x1xi32> to vector<1x1x1xi32>
    %246 = vector.broadcast %245 : vector<1x1x1xi32> to vector<1x1x16xi32>
    %247 = arith.select %244, %246, %200 : vector<1x1x16xi1>, vector<1x1x16xi32>
    %248 = vector.broadcast %236 : vector<1x1x1xi32> to vector<1x16x1xi32>
    %249 = arith.cmpi eq, %205, %248 : vector<1x16x1xi32>
    %250 = vector.shape_cast %242 : vector<1x1x1xi32> to vector<1x1x1xi32>
    %251 = vector.broadcast %250 : vector<1x1x1xi32> to vector<1x16x1xi32>
    %252 = arith.select %249, %251, %205 : vector<1x16x1xi1>, vector<1x16x1xi32>
    %c5_i32 = arith.constant 5 : i32
    %253 = vector.broadcast %252 : vector<1x16x1xi32> to vector<1x16x16xi32>
    %254 = vector.broadcast %247 : vector<1x1x16xi32> to vector<1x16x16xi32>
    %255 = arith.cmpi ne, %253, %254 : vector<1x16x16xi32>
    %256 = vector.broadcast %cst_8 : f32 to vector<1x16x16xf32>
    %257 = arith.select %255, %15, %256 : vector<1x16x16xi1>, vector<1x16x16xf32>
    %cst_44 = arith.constant dense<0xFF800000> : vector<1x16xf32>
    %258 = vector.multi_reduction <maximumf>, %257, %cst_44 [2] : vector<1x16x16xf32> to vector<1x16xf32>
    %259 = vector.shape_cast %258 : vector<1x16xf32> to vector<1x16x1xf32>
    %260 = vector.broadcast %259 : vector<1x16x1xf32> to vector<1x16x16xf32>
    %261 = arith.cmpf oeq, %257, %260 : vector<1x16x16xf32>
    %262 = vector.broadcast %c16_i32 : i32 to vector<1x16x16xi32>
    %263 = arith.select %261, %12, %262 : vector<1x16x16xi1>, vector<1x16x16xi32>
    %cst_45 = arith.constant dense<2147483647> : vector<1x16xi32>
    %264 = vector.multi_reduction <minsi>, %263, %cst_45 [2] : vector<1x16x16xi32> to vector<1x16xi32>
    %265 = vector.shape_cast %264 : vector<1x16xi32> to vector<1x16x1xi32>
    %cst_46 = arith.constant dense<0xFF800000> : vector<1x1xf32>
    %266 = vector.multi_reduction <maximumf>, %259, %cst_46 [1] : vector<1x16x1xf32> to vector<1x1xf32>
    %267 = vector.shape_cast %266 : vector<1x1xf32> to vector<1x1x1xf32>
    %268 = vector.broadcast %267 : vector<1x1x1xf32> to vector<1x16x1xf32>
    %269 = arith.cmpf oeq, %259, %268 : vector<1x16x1xf32>
    %270 = vector.broadcast %c16_i32 : i32 to vector<1x16x1xi32>
    %271 = arith.select %269, %16, %270 : vector<1x16x1xi1>, vector<1x16x1xi32>
    %cst_47 = arith.constant dense<2147483647> : vector<1x1xi32>
    %272 = vector.multi_reduction <minsi>, %271, %cst_47 [1] : vector<1x16x1xi32> to vector<1x1xi32>
    %273 = vector.shape_cast %272 : vector<1x1xi32> to vector<1x1x1xi32>
    %274 = vector.broadcast %273 : vector<1x1x1xi32> to vector<1x16x1xi32>
    %275 = arith.cmpi eq, %16, %274 : vector<1x16x1xi32>
    %276 = vector.broadcast %c-1_i32 : i32 to vector<1x16x1xi32>
    %277 = arith.select %275, %265, %276 : vector<1x16x1xi1>, vector<1x16x1xi32>
    %cst_48 = arith.constant dense<-2147483648> : vector<1x1xi32>
    %278 = vector.multi_reduction <maxsi>, %277, %cst_48 [1] : vector<1x16x1xi32> to vector<1x1xi32>
    %279 = vector.shape_cast %278 : vector<1x1xi32> to vector<1x1x1xi32>
    %280 = vector.broadcast %c-1_i32 : i32 to vector<1x16x1xi32>
    %281 = arith.select %275, %252, %280 : vector<1x16x1xi1>, vector<1x16x1xi32>
    %cst_49 = arith.constant dense<-2147483648> : vector<1x1xi32>
    %282 = vector.multi_reduction <maxsi>, %281, %cst_49 [1] : vector<1x16x1xi32> to vector<1x1xi32>
    %283 = vector.shape_cast %282 : vector<1x1xi32> to vector<1x1x1xi32>
    %284 = vector.broadcast %279 : vector<1x1x1xi32> to vector<1x1x16xi32>
    %285 = arith.cmpi eq, %17, %284 : vector<1x1x16xi32>
    %286 = vector.broadcast %c-1_i32 : i32 to vector<1x1x16xi32>
    %287 = arith.select %285, %247, %286 : vector<1x1x16xi1>, vector<1x1x16xi32>
    %cst_50 = arith.constant dense<-2147483648> : vector<1x1xi32>
    %288 = vector.multi_reduction <maxsi>, %287, %cst_50 [2] : vector<1x1x16xi32> to vector<1x1xi32>
    %289 = vector.shape_cast %288 : vector<1x1xi32> to vector<1x1x1xi32>
    %290 = vector.broadcast %283 : vector<1x1x1xi32> to vector<1x1x16xi32>
    %291 = arith.cmpi eq, %247, %290 : vector<1x1x16xi32>
    %292 = vector.shape_cast %289 : vector<1x1x1xi32> to vector<1x1x1xi32>
    %293 = vector.broadcast %292 : vector<1x1x1xi32> to vector<1x1x16xi32>
    %294 = arith.select %291, %293, %247 : vector<1x1x16xi1>, vector<1x1x16xi32>
    %295 = vector.broadcast %283 : vector<1x1x1xi32> to vector<1x16x1xi32>
    %296 = arith.cmpi eq, %252, %295 : vector<1x16x1xi32>
    %297 = vector.shape_cast %289 : vector<1x1x1xi32> to vector<1x1x1xi32>
    %298 = vector.broadcast %297 : vector<1x1x1xi32> to vector<1x16x1xi32>
    %299 = arith.select %296, %298, %252 : vector<1x16x1xi1>, vector<1x16x1xi32>
    %c6_i32 = arith.constant 6 : i32
    %300 = vector.broadcast %299 : vector<1x16x1xi32> to vector<1x16x16xi32>
    %301 = vector.broadcast %294 : vector<1x1x16xi32> to vector<1x16x16xi32>
    %302 = arith.cmpi ne, %300, %301 : vector<1x16x16xi32>
    %303 = vector.broadcast %cst_8 : f32 to vector<1x16x16xf32>
    %304 = arith.select %302, %15, %303 : vector<1x16x16xi1>, vector<1x16x16xf32>
    %cst_51 = arith.constant dense<0xFF800000> : vector<1x16xf32>
    %305 = vector.multi_reduction <maximumf>, %304, %cst_51 [2] : vector<1x16x16xf32> to vector<1x16xf32>
    %306 = vector.shape_cast %305 : vector<1x16xf32> to vector<1x16x1xf32>
    %307 = vector.broadcast %306 : vector<1x16x1xf32> to vector<1x16x16xf32>
    %308 = arith.cmpf oeq, %304, %307 : vector<1x16x16xf32>
    %309 = vector.broadcast %c16_i32 : i32 to vector<1x16x16xi32>
    %310 = arith.select %308, %12, %309 : vector<1x16x16xi1>, vector<1x16x16xi32>
    %cst_52 = arith.constant dense<2147483647> : vector<1x16xi32>
    %311 = vector.multi_reduction <minsi>, %310, %cst_52 [2] : vector<1x16x16xi32> to vector<1x16xi32>
    %312 = vector.shape_cast %311 : vector<1x16xi32> to vector<1x16x1xi32>
    %cst_53 = arith.constant dense<0xFF800000> : vector<1x1xf32>
    %313 = vector.multi_reduction <maximumf>, %306, %cst_53 [1] : vector<1x16x1xf32> to vector<1x1xf32>
    %314 = vector.shape_cast %313 : vector<1x1xf32> to vector<1x1x1xf32>
    %315 = vector.broadcast %314 : vector<1x1x1xf32> to vector<1x16x1xf32>
    %316 = arith.cmpf oeq, %306, %315 : vector<1x16x1xf32>
    %317 = vector.broadcast %c16_i32 : i32 to vector<1x16x1xi32>
    %318 = arith.select %316, %16, %317 : vector<1x16x1xi1>, vector<1x16x1xi32>
    %cst_54 = arith.constant dense<2147483647> : vector<1x1xi32>
    %319 = vector.multi_reduction <minsi>, %318, %cst_54 [1] : vector<1x16x1xi32> to vector<1x1xi32>
    %320 = vector.shape_cast %319 : vector<1x1xi32> to vector<1x1x1xi32>
    %321 = vector.broadcast %320 : vector<1x1x1xi32> to vector<1x16x1xi32>
    %322 = arith.cmpi eq, %16, %321 : vector<1x16x1xi32>
    %323 = vector.broadcast %c-1_i32 : i32 to vector<1x16x1xi32>
    %324 = arith.select %322, %312, %323 : vector<1x16x1xi1>, vector<1x16x1xi32>
    %cst_55 = arith.constant dense<-2147483648> : vector<1x1xi32>
    %325 = vector.multi_reduction <maxsi>, %324, %cst_55 [1] : vector<1x16x1xi32> to vector<1x1xi32>
    %326 = vector.shape_cast %325 : vector<1x1xi32> to vector<1x1x1xi32>
    %327 = vector.broadcast %c-1_i32 : i32 to vector<1x16x1xi32>
    %328 = arith.select %322, %299, %327 : vector<1x16x1xi1>, vector<1x16x1xi32>
    %cst_56 = arith.constant dense<-2147483648> : vector<1x1xi32>
    %329 = vector.multi_reduction <maxsi>, %328, %cst_56 [1] : vector<1x16x1xi32> to vector<1x1xi32>
    %330 = vector.shape_cast %329 : vector<1x1xi32> to vector<1x1x1xi32>
    %331 = vector.broadcast %326 : vector<1x1x1xi32> to vector<1x1x16xi32>
    %332 = arith.cmpi eq, %17, %331 : vector<1x1x16xi32>
    %333 = vector.broadcast %c-1_i32 : i32 to vector<1x1x16xi32>
    %334 = arith.select %332, %294, %333 : vector<1x1x16xi1>, vector<1x1x16xi32>
    %cst_57 = arith.constant dense<-2147483648> : vector<1x1xi32>
    %335 = vector.multi_reduction <maxsi>, %334, %cst_57 [2] : vector<1x1x16xi32> to vector<1x1xi32>
    %336 = vector.shape_cast %335 : vector<1x1xi32> to vector<1x1x1xi32>
    %337 = vector.broadcast %330 : vector<1x1x1xi32> to vector<1x1x16xi32>
    %338 = arith.cmpi eq, %294, %337 : vector<1x1x16xi32>
    %339 = vector.shape_cast %336 : vector<1x1x1xi32> to vector<1x1x1xi32>
    %340 = vector.broadcast %339 : vector<1x1x1xi32> to vector<1x1x16xi32>
    %341 = arith.select %338, %340, %294 : vector<1x1x16xi1>, vector<1x1x16xi32>
    %342 = vector.broadcast %330 : vector<1x1x1xi32> to vector<1x16x1xi32>
    %343 = arith.cmpi eq, %299, %342 : vector<1x16x1xi32>
    %344 = vector.shape_cast %336 : vector<1x1x1xi32> to vector<1x1x1xi32>
    %345 = vector.broadcast %344 : vector<1x1x1xi32> to vector<1x16x1xi32>
    %346 = arith.select %343, %345, %299 : vector<1x16x1xi1>, vector<1x16x1xi32>
    %c7_i32 = arith.constant 7 : i32
    %347 = vector.broadcast %346 : vector<1x16x1xi32> to vector<1x16x16xi32>
    %348 = vector.broadcast %341 : vector<1x1x16xi32> to vector<1x16x16xi32>
    %349 = arith.cmpi ne, %347, %348 : vector<1x16x16xi32>
    %350 = vector.broadcast %cst_8 : f32 to vector<1x16x16xf32>
    %351 = arith.select %349, %15, %350 : vector<1x16x16xi1>, vector<1x16x16xf32>
    %cst_58 = arith.constant dense<0xFF800000> : vector<1x16xf32>
    %352 = vector.multi_reduction <maximumf>, %351, %cst_58 [2] : vector<1x16x16xf32> to vector<1x16xf32>
    %353 = vector.shape_cast %352 : vector<1x16xf32> to vector<1x16x1xf32>
    %354 = vector.broadcast %353 : vector<1x16x1xf32> to vector<1x16x16xf32>
    %355 = arith.cmpf oeq, %351, %354 : vector<1x16x16xf32>
    %356 = vector.broadcast %c16_i32 : i32 to vector<1x16x16xi32>
    %357 = arith.select %355, %12, %356 : vector<1x16x16xi1>, vector<1x16x16xi32>
    %cst_59 = arith.constant dense<2147483647> : vector<1x16xi32>
    %358 = vector.multi_reduction <minsi>, %357, %cst_59 [2] : vector<1x16x16xi32> to vector<1x16xi32>
    %359 = vector.shape_cast %358 : vector<1x16xi32> to vector<1x16x1xi32>
    %cst_60 = arith.constant dense<0xFF800000> : vector<1x1xf32>
    %360 = vector.multi_reduction <maximumf>, %353, %cst_60 [1] : vector<1x16x1xf32> to vector<1x1xf32>
    %361 = vector.shape_cast %360 : vector<1x1xf32> to vector<1x1x1xf32>
    %362 = vector.broadcast %361 : vector<1x1x1xf32> to vector<1x16x1xf32>
    %363 = arith.cmpf oeq, %353, %362 : vector<1x16x1xf32>
    %364 = vector.broadcast %c16_i32 : i32 to vector<1x16x1xi32>
    %365 = arith.select %363, %16, %364 : vector<1x16x1xi1>, vector<1x16x1xi32>
    %cst_61 = arith.constant dense<2147483647> : vector<1x1xi32>
    %366 = vector.multi_reduction <minsi>, %365, %cst_61 [1] : vector<1x16x1xi32> to vector<1x1xi32>
    %367 = vector.shape_cast %366 : vector<1x1xi32> to vector<1x1x1xi32>
    %368 = vector.broadcast %367 : vector<1x1x1xi32> to vector<1x16x1xi32>
    %369 = arith.cmpi eq, %16, %368 : vector<1x16x1xi32>
    %370 = vector.broadcast %c-1_i32 : i32 to vector<1x16x1xi32>
    %371 = arith.select %369, %359, %370 : vector<1x16x1xi1>, vector<1x16x1xi32>
    %cst_62 = arith.constant dense<-2147483648> : vector<1x1xi32>
    %372 = vector.multi_reduction <maxsi>, %371, %cst_62 [1] : vector<1x16x1xi32> to vector<1x1xi32>
    %373 = vector.shape_cast %372 : vector<1x1xi32> to vector<1x1x1xi32>
    %374 = vector.broadcast %c-1_i32 : i32 to vector<1x16x1xi32>
    %375 = arith.select %369, %346, %374 : vector<1x16x1xi1>, vector<1x16x1xi32>
    %cst_63 = arith.constant dense<-2147483648> : vector<1x1xi32>
    %376 = vector.multi_reduction <maxsi>, %375, %cst_63 [1] : vector<1x16x1xi32> to vector<1x1xi32>
    %377 = vector.shape_cast %376 : vector<1x1xi32> to vector<1x1x1xi32>
    %378 = vector.broadcast %373 : vector<1x1x1xi32> to vector<1x1x16xi32>
    %379 = arith.cmpi eq, %17, %378 : vector<1x1x16xi32>
    %380 = vector.broadcast %c-1_i32 : i32 to vector<1x1x16xi32>
    %381 = arith.select %379, %341, %380 : vector<1x1x16xi1>, vector<1x1x16xi32>
    %cst_64 = arith.constant dense<-2147483648> : vector<1x1xi32>
    %382 = vector.multi_reduction <maxsi>, %381, %cst_64 [2] : vector<1x1x16xi32> to vector<1x1xi32>
    %383 = vector.shape_cast %382 : vector<1x1xi32> to vector<1x1x1xi32>
    %384 = vector.broadcast %377 : vector<1x1x1xi32> to vector<1x1x16xi32>
    %385 = arith.cmpi eq, %341, %384 : vector<1x1x16xi32>
    %386 = vector.shape_cast %383 : vector<1x1x1xi32> to vector<1x1x1xi32>
    %387 = vector.broadcast %386 : vector<1x1x1xi32> to vector<1x1x16xi32>
    %388 = arith.select %385, %387, %341 : vector<1x1x16xi1>, vector<1x1x16xi32>
    %389 = vector.broadcast %377 : vector<1x1x1xi32> to vector<1x16x1xi32>
    %390 = arith.cmpi eq, %346, %389 : vector<1x16x1xi32>
    %391 = vector.shape_cast %383 : vector<1x1x1xi32> to vector<1x1x1xi32>
    %392 = vector.broadcast %391 : vector<1x1x1xi32> to vector<1x16x1xi32>
    %393 = arith.select %390, %392, %346 : vector<1x16x1xi1>, vector<1x16x1xi32>
    %394 = vector.broadcast %393 : vector<1x16x1xi32> to vector<1x16x16xi32>
    %395 = vector.broadcast %388 : vector<1x1x16xi32> to vector<1x16x16xi32>
    %396 = arith.cmpi eq, %394, %395 : vector<1x16x16xi32>
    %397 = arith.extui %396 : vector<1x16x16xi1> to vector<1x16x16xi32>
    %398 = arith.sitofp %397 : vector<1x16x16xi32> to vector<1x16x16xf32>
    %cst_65 = arith.constant dense<0.000000e+00> : vector<1x16xf32>
    %399 = vector.multi_reduction <add>, %398, %cst_65 [1] : vector<1x16x16xf32> to vector<1x16xf32>
    %400 = vector.shape_cast %399 : vector<1x16xf32> to vector<1x1x16xf32>
    %401 = tpu.iota {dimensions = array<i32: 1>} : vector<1x16x16xi32>
    %402 = vector.broadcast %388 : vector<1x1x16xi32> to vector<1x16x16xi32>
    %403 = arith.cmpi eq, %401, %402 : vector<1x16x16xi32>
    %404 = arith.extui %403 : vector<1x16x16xi1> to vector<1x16x16xi32>
    %405 = arith.sitofp %404 : vector<1x16x16xi32> to vector<1x16x16xf32>
    %cst_66 = arith.constant dense<0.000000e+00> : vector<1x16xf32>
    %406 = vector.multi_reduction <add>, %405, %cst_66 [2] : vector<1x16x16xf32> to vector<1x16xf32>
    %407 = vector.shape_cast %406 : vector<1x16xf32> to vector<1x16x1xf32>
    %cst_67 = arith.constant 0.000000e+00 : f32
    %408 = vector.broadcast %cst_67 : f32 to vector<1x16x1xf32>
    %409 = arith.cmpf ogt, %407, %408 : vector<1x16x1xf32>
    %410 = arith.extui %409 : vector<1x16x1xi1> to vector<1x16x1xi32>
    %411 = arith.sitofp %410 : vector<1x16x1xi32> to vector<1x16x1xf32>
    %412 = vector.broadcast %388 : vector<1x1x16xi32> to vector<1x16x16xi32>
    %413 = arith.cmpi sle, %401, %412 : vector<1x16x16xi32>
    %414 = arith.extui %413 : vector<1x16x16xi1> to vector<1x16x16xi32>
    %415 = arith.sitofp %414 : vector<1x16x16xi32> to vector<1x16x16xf32>
    %416 = vector.broadcast %411 : vector<1x16x1xf32> to vector<1x16x16xf32>
    %417 = arith.mulf %416, %415 : vector<1x16x16xf32>
    %cst_68 = arith.constant dense<0.000000e+00> : vector<1x16xf32>
    %418 = vector.multi_reduction <add>, %417, %cst_68 [1] : vector<1x16x16xf32> to vector<1x16xf32>
    %419 = vector.shape_cast %418 : vector<1x16xf32> to vector<1x1x16xf32>
    %cst_69 = arith.constant 1.000000e+00 : f32
    %420 = vector.broadcast %cst_69 : f32 to vector<1x1x16xf32>
    %421 = arith.subf %419, %420 : vector<1x1x16xf32>
    %422 = arith.fptosi %421 : vector<1x1x16xf32> to vector<1x1x16xi32>
    %423 = tpu.iota {dimensions = array<i32: 1>} : vector<1x8x16xi32>
    %424 = vector.broadcast %422 : vector<1x1x16xi32> to vector<1x8x16xi32>
    %425 = arith.cmpi eq, %423, %424 : vector<1x8x16xi32>
    %426 = arith.extui %425 : vector<1x8x16xi1> to vector<1x8x16xi32>
    %427 = arith.sitofp %426 : vector<1x8x16xi32> to vector<1x8x16xf32>
    %cst_70 = arith.constant 1.000000e+00 : f32
    %428 = vector.broadcast %cst_70 : f32 to vector<1x1x16xf32>
    %429 = arith.divf %428, %400 : vector<1x1x16xf32>
    %430 = vector.broadcast %429 : vector<1x1x16xf32> to vector<1x8x16xf32>
    %431 = arith.mulf %427, %430 : vector<1x8x16xf32>
    "tpu.trace_start"() <{level = 10 : i32, message = "bot,btd->bod"}> : () -> ()
    %cst_71 = arith.constant dense<0.000000e+00> : vector<1x8x32xf32>
    %432 = tpu.matmul %431, %1, %cst_71 {dimension_numbers = #tpu.dot_dimension_numbers<[2], [1], [1], [2], [0, 0, 0, 1, 1, 2], [0], [0]>} : vector<1x8x16xf32>, vector<1x16x32xf32>, vector<1x8x32xf32> -> vector<1x8x32xf32>
    "tpu.trace_stop"() : () -> ()
    %cst_72 = arith.constant dense<0.000000e+00> : vector<1x8xf32>
    %433 = vector.multi_reduction <add>, %427, %cst_72 [2] : vector<1x8x16xf32> to vector<1x8xf32>
    %434 = vector.shape_cast %433 : vector<1x8xf32> to vector<1x8x1xf32>
    %c0_73 = arith.constant 0 : index
    %c0_74 = arith.constant 0 : index
    %c0_75 = arith.constant 0 : index
    %435 = vector.load %arg3[%c0_73, %c0_74, %c0_75] : memref<1x8x32xf32, #tpu.memory_space<vmem>>, vector<1x8x32xf32>
    tpu.vector_store %arg3[%c0_73, %c0_74, %c0_75], %432 {strides = array<i32>} : memref<1x8x32xf32, #tpu.memory_space<vmem>>, vector<1x8x32xf32>,
    %c0_76 = arith.constant 0 : index
    %c0_77 = arith.constant 0 : index
    %c0_78 = arith.constant 0 : index
    %436 = vector.load %arg4[%c0_76, %c0_77, %c0_78] : memref<1x8x1xf32, #tpu.memory_space<vmem>>, vector<1x8x1xf32>
    tpu.vector_store %arg4[%c0_76, %c0_77, %c0_78], %434 {strides = array<i32>} : memref<1x8x1xf32, #tpu.memory_space<vmem>>, vector<1x8x1xf32>,
    return
  }
  func.func @transform_0(%arg0: i32) -> (i32, i32, i32) {
    %c0_i32 = arith.constant 0 : i32
    %c0_i32_0 = arith.constant 0 : i32
    %c0_i32_1 = arith.constant 0 : i32
    return %arg0, %c0_i32, %c0_i32_0 : i32, i32, i32
  }
  func.func @transform_1(%arg0: i32) -> (i32, i32, i32) {
    %c0_i32 = arith.constant 0 : i32
    %c0_i32_0 = arith.constant 0 : i32
    %c0_i32_1 = arith.constant 0 : i32
    return %arg0, %c0_i32, %c0_i32_0 : i32, i32, i32
  }
  func.func @transform_2(%arg0: i32) -> (i32, i32, i32) {
    %c0_i32 = arith.constant 0 : i32
    %c0_i32_0 = arith.constant 0 : i32
    %c0_i32_1 = arith.constant 0 : i32
    return %arg0, %c0_i32, %c0_i32_0 : i32, i32, i32
  }
  func.func @transform_3(%arg0: i32) -> (i32, i32, i32) {
    %c0_i32 = arith.constant 0 : i32
    %c0_i32_0 = arith.constant 0 : i32
    %c0_i32_1 = arith.constant 0 : i32
    return %arg0, %c0_i32, %c0_i32_0 : i32, i32, i32
  }
}

</mosaic_0001>

<bundles_post_ra>
// kernel: tpu_custom_call.1
= control target key start
LH: loop header
LB: loop body
LE: loop exit
PB: predicated region body
PF: predicated region fallthrough
CT: control target
= control target key end

     0   :  { %9 = vsyncpa [#allocation3], 0  ;;  %s2438_s0 = inlined_call_operand.hbm [shape: f32[2,16,32], index: 0, kind: input, shape index: {}]   ;;  %s2439_s1 = inlined_call_operand.hbm [shape: f32[2,16,32], index: 1, kind: input, shape index: {}]   ;;  %s2440_s2 = inlined_call_operand.hbm [shape: f32[2,8,32], index: 2, kind: output, shape index: {0}]   ;;  %s2441_s3 = inlined_call_operand.vmem [shape: f32[2,8,1], index: 3, kind: output, shape index: {1}]  }
   0x1   :  { %11 = vsyncpa [#allocation3 + $0x1], 0 }
   0x2   :  { %12 = vsyncpa [#allocation6], 0 }
   0x3   :  { %14 = vsyncpa [#allocation6 + $0x1], 0 }
   0x4   :  { %15 = vsyncpa [#allocation4], 0 }
   0x5   :  { %17 = vsyncpa [#allocation4 + $0x1], 0  ;;  %s1850_s12 = smov 0   ;;  %s1852_s13 = smov 0  }
   0x6   :  { %s1854_s14 = smov 0   ;;  %s1856_s15 = smov 0  }
   0x7 LB: > { %s1871_s16 = sadd.s32 4294967295, %s1820_s15   ;;  %s1561_s17 = sadd.s32 4294967294, %s1820_s15   ;;  %s1820_s15 = sphi %s1856_s15, %s2457_s15   ;;  %s1816_s14 = sphi %s1854_s14, %s2456_s14   ;;  %s1812_s13 = sphi %s1852_s13, %s2455_s13   ;;  %s1808_s12 = sphi %s1850_s12, %s2454_s12  }
   0x8   : > { %s1875_s18 = sadd.s32 1, %s1820_s15   ;;  %s30_s19 = sadd.s32 1, %s1816_s14 }
   0x9   : > { %s27_s20 = ssub.s32 %s1820_s15, %s1875_s18  ;;  %p37_p0 = scmp.ne.s32.totalorder %s1816_s14, %s1812_s13 }
   0xa   : > { %p28_p1 = scmp.eq.s32.totalorder %s27_s20, 0  ;;  %p38_p2 = scmp.eq.s32.totalorder %s1820_s15, 0 }
   0xb   : > { %p43_p3 = scmp.ne.s32.totalorder %s1812_s13, %s1808_s12  ;;  %p44_p4 = scmp.eq.s32.totalorder %s1871_s16, 0 }
   0xc   : > { %s1887_s21 = scalar_select %p28_p1, %s1816_s14, %s30_s19  }
   0xd   : > { %p1889_p5 = por %p38_p2, %p37_p0  ;;  %p1893_p6 = por %p44_p4, %p43_p3 }
   0xe   : > { %p93_p7 = scmp.eq.s32.totalorder %s1871_s16, 1  ;;  %p99_p8 = scmp.eq.s32.totalorder %s1561_s17, 1 }
   0xf   : > { %s2445_s23 = scalar_select %p1893_p6, 1, 0 }
  0x10   : > { %p1645_p10 = scmp.lt.s32.totalorder %s1820_s15, 2  ;;  %p1900_p11 = por %p93_p7, %p37_p0 }
  0x11   : > { %p1904_p12 = por %p99_p8, %p43_p3  ;;  %s1909_s26 = sand.u32 1, %s1816_s14  }
  0x12   : > { %s2446_s24 = scalar_select %p1900_p11, 1, 0 }
  0x13   : > { %s2447_s25 = scalar_select %p1904_p12, 1, 0 }
  0x14   : > { %s1594_s27 = sshll.u32 %s1820_s15, 8  ;;  %s1564_s28 = sshll.u32 %s1909_s26, 4 }
  0x15   : > { %s1918_s4 = scalar_lea.hbm %s2438_s0, %s1594_s27  ;;  %s149_s5 = scalar_lea.vmem [#allocation2], %s1564_s28 }
  0x16   : > { %s156_s6 = sshll.u32 %s149_s5, 4  ;;  %p1924_p13 = pnand %p1645_p10, %p1889_p5  ;;  %s1928_s6 = int_to_ptr.vmem [resolvable:$true] %s156_s6 }
  0x17   : > { %s146_s8 = scalar_lea.sflag [#allocation3], %s1909_s26  ;;  %s1690_s9 = scalar_lea.hbm %s1918_s4, 256 }
  0x18   : > { %p1691_p0 = scmp.ne.s32.totalorder %s1918_s4, %s1690_s9  ;;  %p1692_p1 = pneg %p1924_p13 }
  0x19   : > { %s1695_s17 = scalar_lea.hbm %s2438_s0, 512  ;;  %p1696_p4 = scmp.lt.u32.totalorder %s1918_s4, %s2438_s0 }
  0x1a   : > { %p1693_p2 = pnand %p1692_p1, %p1691_p0  ;;  %p1697_p5 = scmp.lt.u32.totalorder %s1695_s17, %s1690_s9 }
  0x1b   : > { %p1699_p8 = scmp.lt.u32.totalorder %s1690_s9, %s1918_s4 }
  0x1c   : > { %p1694_p3 = pneg %p1693_p2  ;;  %p1698_p7 = por %p1697_p5, %p1696_p4 }
  0x1e   : > { %p1700_p10 = por %p1699_p8, %p1698_p7 }
  0x20   : > { %p1701_p9 = pnand %p1700_p10, %p1694_p3 }
  0x22   : > { %1704 = shalt.err (!%p1701_p9)
}
  0x23   : > { %s1705_s22 = scalar_lea.vmem %s1928_s6, 256  ;;  %s1822_s29 = smov [#allocation2]  }
  0x24   : > { %p1706_p0 = scmp.ne.s32.totalorder %s1928_s6, %s1705_s22  ;;  %s1710_s30 = sshll.u32 %s1822_s29, 4  ;;  %s1711_s30 = int_to_ptr.vmem [resolvable:$false] %s1710_s30 }
  0x25   : > { %s1712_s5 = scalar_lea.vmem %s1711_s30, 512  ;;  %p1713_p11 = scmp.lt.s32.totalorder %s1928_s6, %s1711_s30 }
  0x26   : > { %p1708_p2 = pnand %p1706_p0, %p1692_p1  ;;  %p1714_p4 = scmp.lt.s32.totalorder %s1712_s5, %s1705_s22 }
  0x28   : > { %p1709_p12 = pneg %p1708_p2  ;;  %p1715_p5 = por %p1714_p4, %p1713_p11 }
  0x2a   : > { %p1716_p7 = pnand %p1715_p5, %p1709_p12 }
  0x2c   : > { %1719 = shalt.err (!%p1716_p7)
}
  0x2d   : > { %s1823_s9 = smov 128   ;;  %s1824_s10 = smov 8  }
  0x2e   : > { %1637 = dma.hbm_to_vmem [thread:$0]  (!%p1924_p13), %s1918_s4, 256, %s1928_s6, %s146_s8, %s1823_s9, %s1823_s9, %s1824_s10  }
  0x2f   : > { %p1570_p9 = scmp.ge.s32.totalorder %s1820_s15, 1  ;;  %p185_p11 = scmp.lt.s32.totalorder %s1820_s15, 3 }
  0x30   : > { %s1972_s20 = scalar_lea.hbm %s2439_s1, %s1594_s27  ;;  %s170_s22 = scalar_lea.vmem [#allocation5], %s1564_s28 }
  0x31   : > { %p1963_p12 = pnand %p1570_p9, %p185_p11  ;;  %s177_s29 = sshll.u32 %s170_s22, 4  ;;  %s1976_s29 = int_to_ptr.vmem [resolvable:$true] %s177_s29 }
  0x32   : > { %s167_s4 = scalar_lea.sflag [#allocation6], %s1909_s26  ;;  %s1720_s6 = scalar_lea.hbm %s1972_s20, 256 }
  0x33   : > { %p1721_p3 = scmp.ne.s32.totalorder %s1972_s20, %s1720_s6  ;;  %s1725_s27 = scalar_lea.hbm %s2439_s1, 512 }
  0x34   : > { %p1726_p0 = scmp.lt.u32.totalorder %s1972_s20, %s2439_s1  ;;  %p1727_p2 = scmp.lt.u32.totalorder %s1725_s27, %s1720_s6 }
  0x35   : > { %p1723_p8 = pnand %p1721_p3, %p1692_p1  ;;  %p1729_p5 = scmp.lt.u32.totalorder %s1720_s6, %s1972_s20 }
  0x36   : > { %p1728_p4 = por %p1727_p2, %p1726_p0 }
  0x37   : > { %p1724_p10 = pneg %p1723_p8 }
  0x38   : > { %p1730_p7 = por %p1729_p5, %p1728_p4 }
  0x3a   : > { %p1731_p9 = pnand %p1730_p7, %p1724_p10 }
  0x3c   : > { %1734 = shalt.err (!%p1731_p9)
}
  0x3d   : > { %s1735_s28 = scalar_lea.vmem %s1976_s29, 256  ;;  %s1825_s19 = smov [#allocation5]  }
  0x3e   : > { %p1736_p11 = scmp.ne.s32.totalorder %s1976_s29, %s1735_s28  ;;  %s1740_s22 = sshll.u32 %s1825_s19, 4  ;;  %s1741_s22 = int_to_ptr.vmem [resolvable:$false] %s1740_s22 }
  0x3f   : > { %s1742_s8 = scalar_lea.vmem %s1741_s22, 512  ;;  %p1743_p6 = scmp.lt.s32.totalorder %s1976_s29, %s1741_s22 }
  0x40   : > { %p1738_p3 = pnand %p1736_p11, %p1692_p1  ;;  %p1744_p0 = scmp.lt.s32.totalorder %s1742_s8, %s1735_s28 }
  0x42   : > { %p1739_p8 = pneg %p1738_p3  ;;  %p1745_p2 = por %p1744_p0, %p1743_p6 }
  0x44   : > { %p1746_p4 = pnand %p1745_p2, %p1739_p8 }
  0x46   : > { %1749 = shalt.err (!%p1746_p4)
}
  0x47   : > { %1640 = dma.hbm_to_vmem [thread:$0]  (!%p1924_p13), %s1972_s20, 256, %s1976_s29, %s167_s4, %s1823_s9, %s1823_s9, %s1824_s10  }
  0x48   : > { %189 = sbr.rel (%p1963_p12) target bundleno = 6914 (0x1b02), region = 28  ;;  %s2010_s6 = sand.u32 (!%p1963_p12), 1, %s1812_s13  }
  0x49   : > { %s1571_s30 = sshll.u32 (!%p1963_p12), %s2010_s6, 4  ;;  %s192_s27 = scalar_lea.sflag (!%p1963_p12), [#allocation3], %s2010_s6 }
  0x4a   : > { %s195_s7 = scalar_lea.vmem (!%p1963_p12), [#allocation2], %s1571_s30  ;;  %p2450_p6 = scmp.ne.s32.totalorder (!%p1963_p12), %s2445_s23, 0 }
  0x4f   : > { %1795 = dma.done.wait (%p2450_p6), %s192_s27, 256  }
  0x50   : > { %1797 = vsyncadd (%p2450_p6), %s192_s27, 4294967040  ;;  %s201_s26 = scalar_lea.sflag [#allocation6], %s2010_s6  ;;  %s2019_s9 = scalar_lea.vmem [#allocation5], %s1571_s30 }
  0x51   : > { %1799 = dma.done.wait (%p2450_p6), %s201_s26, 256  }
  0x52   : > { %1801 = vsyncadd (%p2450_p6), %s201_s26, 4294967040  ;;  %v240_v0 = vld [vmem:[%s195_s7] sm:$0xff]  ;;  %vm246_vm0 = vcmask 261120   ;;  %v241_v1 = vld [vmem:[%s195_s7 + $0x8] sm:$0xff]  ;;  %v340_v15 = vlaneseq  ;;  %vm353_vm5 = vcmask 130048   ;;  %p236_p13 = scmp.lt.s32.totalorder %s1871_s16, 1 }
  0x53   : > { %v244_v2 = vmul.f32 %v240_v0, %v240_v0  ;;  %v245_v3 = vmul.f32 %v241_v1, %v241_v1  ;;  %vm1618_vm1 = vmpackc.low %vm246_vm0, %vm246_vm0  ;;  %s1573_s4 = sshll.u32 %s2010_s6, 3  ;;  %s1591_s5 = sshll.u32 %s1871_s16, 7 }
  0x54   : > { %v2031_v16 = vshrl.u32 %v340_v15, 7  ;;  %v2036_v18 = vand.u32 127, %v340_v15  ;;  %s237_s23 = scalar_select %p236_p13, %s1871_s16, 1 }
  0x55   : > { %v247_v4 = vsel %vm246_vm0, %v244_v2, 0.0  ;;  %v250_v5 = vsel %vm246_vm0, %v245_v3, 0.0  ;;  %s229_s17 = scalar_lea.vmem [#allocation7], %s1573_s4  ;;  %s2393_s8 = scalar_lea.hbm %s2440_s2, %s1591_s5 }
  0x56   : > { %248 = vadd.xlane.f32.xlu0 %v247_v4  ;;  %v2034_v17 = vadd.s32 8, %v2031_v16  ;;  %vm345_vm3 = vcmp.lt.s32.totalorder %v2031_v16, %v2036_v18  ;;  %vm349_vm4 = vcmp.ne.s32.totalorder %v2031_v16, %v2036_v18  ;;  %s1574_s10 = sshll.u32 %s237_s23, 3  ;;  %s1441_s28 = sshll.u32 %s229_s17, 4  ;;  %s2395_s28 = int_to_ptr.vmem [resolvable:$true] %s1441_s28 }
  0x57   : > { %s239_s29 = scalar_lea.vmem %s2441_s3, %s1574_s10  ;;  %s1424_s30 = scalar_lea.sflag [#allocation4], %s2010_s6 }
  0x58   : > { %vm346_vm2 = vcmp.lt.s32.totalorder %v2034_v17, %v2036_v18  ;;  %vm350_vm6 = vcmp.ne.s32.totalorder %v2034_v17, %v2036_v18  ;;  %s1750_s27 = scalar_lea.vmem %s2395_s28, 128  ;;  %p2451_p12 = scmp.ne.s32.totalorder %s2446_s24, 0 }
  0x59   : > { %p1751_p1 = scmp.ne.s32.totalorder %s2395_s28, %s1750_s27  ;;  %s1829_s16 = smov [#allocation7]  }
  0x5a   : > { %251 = vadd.xlane.f32.xlu0 %v250_v5  ;;  %s1754_s7 = sshll.u32 %s1829_s16, 4  ;;  %s1755_s7 = int_to_ptr.vmem [resolvable:$false] %s1754_s7 }
  0x5b   : > { %p1752_p10 = pnand %p1751_p1, %p2451_p12  ;;  %s1756_s26 = scalar_lea.vmem %s1755_s7, 256 }
  0x5c   : > { %p1757_p7 = scmp.lt.s32.totalorder %s2395_s28, %s1755_s7  ;;  %p1758_p9 = scmp.lt.s32.totalorder %s1756_s26, %s1750_s27 }
  0x5d   : > { %p1753_p5 = pneg %p1752_p10 }
  0x5e   : > { %p1759_p11 = por %p1758_p9, %p1757_p7 }
  0x60   : > { %p1760_p3 = pnand %p1759_p11, %p1753_p5 }
  0xe3   : > { %v249_v6 = vpop.xlane.xlu0 %248 }
  0xe4   : > { %v253_v7 = vmax.f32 %v249_v6, 1e-30 }
  0xe6   : > { %1684 = vrsqrt.f32 %v253_v7 }
  0xe7   : > { %v252_v8 = vpop.xlane.xlu0 %251 }
  0xe8   : > { %v254_v9 = vmax.f32 %v252_v8, 1e-30 }
  0xea   : > { %1686 = vrsqrt.f32 %v254_v9 }
  0xf0   : > { %v1685_v10 = vpop.eup %1684 }
  0xf1   : > { %v257_v11 = vmul.f32 %v1685_v10, %v240_v0 }
  0xf3   : > { %1607 = vmatprep.mubr.msk.f32.mxu0 %vm246_vm0, %v257_v11 }
  0xf4   : > { %v1687_v12 = vpop.eup %1686 }
  0xf5   : > { %v258_v13 = vmul.f32 %v1687_v12, %v241_v1 }
  0xf7   : > { %v1617_v14 = vpack.c.bf16 %v258_v13, %v257_v11 }
  0xf9   : > { %1619 = vmatprep.subr.msk.bf16.mxu0 %vm1618_vm1, %v1617_v14 }
  0xfa   : > { %1622 = vmatpush3.bf16.xpose.msk.msra.mxu0 %vm1618_vm1, %v1617_v14 }
 0x101   : > { %1608 = vmatmul.mubr.msk.f32.vlgmr.msra.gmra.mrb[0].mxu0 %vm246_vm0, %v258_v13 }
 0x1d4   : > { %v1609_v19 = vpop.f32.mrb[0].mxu0 }
 0x1d5   : > { %v331_v20 = vpop.f32.mrb[1].mxu0  ;;  %v2044_v21 = vsel %vm346_vm2, %v1609_v19, -1e+30 }
 0x1d6   : > { %v2046_v22 = vsel %vm345_vm3, %v331_v20, -1e+30  ;;  %v352_v25 = vsel %vm350_vm6, %v2044_v21, -1e+30 }
 0x1d7   : > { %v351_v23 = vsel %vm349_vm4, %v2046_v22, -1e+30  ;;  %v357_v26 = vsel %vm353_vm5, %v352_v25, -inf }
 0x1d8   : > { %v354_v24 = vsel %vm353_vm5, %v351_v23, -inf }
 0x1d9   : > { %355 = vmax.xlane.f32.xlu1 %v354_v24 }
 0x1dd   : > { %358 = vmax.xlane.f32.xlu1 %v357_v26 }
 0x266   : > { %v356_v27 = vpop.xlane.xlu1 %355 }
 0x267   : > { %vm360_vm7 = vcmp.eq.f32.partialorder %v351_v23, %v356_v27 }
 0x268   : > { %v362_v28 = vsel %vm360_vm7, %v2036_v18, 16 }
 0x269   : > { %v364_v29 = vsel %vm353_vm5, %v362_v28, 2147483647 }
 0x26a   : > { %v359_v30 = vpop.xlane.xlu1 %358  ;;  %v366_v31 = vshra.s32 %v364_v29, 16  ;;  %v365_v37 = vand.u32 65535, %v364_v29 }
 0x26b   : > { %vm361_vm8 = vcmp.eq.f32.partialorder %v352_v25, %v359_v30  ;;  %v394_v45 = vmax.f32 %v356_v27, %v359_v30 }
 0x26c   : > { %v368_v32 = vcvt.s32.f32 %v366_v31  ;;  %v363_v33 = vsel %vm361_vm8, %v2036_v18, 16  ;;  %v367_v39 = vcvt.s32.f32 %v365_v37 }
 0x26d   : > { %v379_v34 = vsel %vm353_vm5, %v363_v33, 2147483647  ;;  %v395_v46 = vrot.slane %v394_v45, 4 }
 0x26e   : > { %369 = vmin.xlane.f32.xlu0 %v368_v32  ;;  %v381_v35 = vshra.s32 %v379_v34, 16  ;;  %v380_v40 = vand.u32 65535, %v379_v34 }
 0x26f   : > { %v396_v47 = vmax.f32 %v394_v45, %v395_v46 }
 0x270   : > { %v383_v36 = vcvt.s32.f32 %v381_v35  ;;  %v382_v43 = vcvt.s32.f32 %v380_v40 }
 0x271   : > { %v397_v48 = vrot.slane %v396_v47, 2 }
 0x272   : > { %384 = vmin.xlane.f32.xlu1 %v383_v36 }
 0x273   : > { %v398_v49 = vmax.f32 %v396_v47, %v397_v48 }
 0x275   : > { %v399_v50 = vrot.slane %v398_v49, 1 }
 0x277   : > { %v400_v51 = vmax.f32 %v398_v49, %v399_v50 }
 0x279   : > { %vm401_vm11 = vcmp.eq.f32.partialorder %v356_v27, %v400_v51  ;;  %vm402_vm12 = vcmp.eq.f32.partialorder %v359_v30, %v400_v51 }
 0x27a   : > { %v403_v52 = vsel %vm401_vm11, %v2031_v16, 16  ;;  %v404_v53 = vsel %vm402_vm12, %v2034_v17, 16 }
 0x27b   : > { %vm405_vm13 = vcmp.lt.s32.totalorder %v403_v52, %v404_v53 }
 0x27c   : > { %v406_v54 = vsel %vm405_vm13, %v403_v52, %v404_v53 }
 0x27d   : > { %v407_v55 = vrot.slane %v406_v54, 4 }
 0x27f   : > { %vm408_vm14 = vcmp.lt.s32.totalorder %v406_v54, %v407_v55 }
 0x280   : > { %v409_v56 = vsel %vm408_vm14, %v406_v54, %v407_v55 }
 0x281   : > { %v410_v57 = vrot.slane %v409_v56, 2 }
 0x283   : > { %vm411_vm15 = vcmp.lt.s32.totalorder %v409_v56, %v410_v57 }
 0x284   : > { %v412_v58 = vsel %vm411_vm15, %v409_v56, %v410_v57 }
 0x285   : > { %v413_v59 = vrot.slane %v412_v58, 1 }
 0x287   : > { %vm414_vm1 = vcmp.lt.s32.totalorder %v412_v58, %v413_v59 }
 0x288   : > { %v415_v4 = vsel %vm414_vm1, %v412_v58, %v413_v59 }
 0x289   : > { %vm416_vm2 = vcmp.eq.s32.totalorder %v2031_v16, %v415_v4  ;;  %vm417_vm3 = vcmp.eq.s32.totalorder %v2034_v17, %v415_v4 }
 0x28a   : > { %v431_v29 = vsel %vm416_vm2, %v2031_v16, 4294967295  ;;  %v432_v30 = vsel %vm417_vm3, %v2034_v17, 4294967295 }
 0x28b   : > { %vm433_vm11 = vcmp.gt.s32.totalorder %v431_v29, %v432_v30 }
 0x28c   : > { %v434_v31 = vsel %vm433_vm11, %v431_v29, %v432_v30 }
 0x2fb   : > { %v370_v38 = vpop.xlane.xlu0 %369 }
 0x2fc   : > { %vm371_vm9 = vcmp.eq.f32.partialorder %v368_v32, %v370_v38  ;;  %v376_v60 = vcvt.f32.s32 %v370_v38  ;;  %v435_v32 = vrot.slane %v434_v31, 4 }
 0x2fd   : > { %v372_v41 = vsel %vm371_vm9, %v367_v39, inf }
 0x2fe   : > { %373 = vmin.xlane.f32.xlu0 %v372_v41  ;;  %v377_v0 = vshll.u32 %v376_v60, 16  ;;  %vm436_vm12 = vcmp.gt.s32.totalorder %v434_v31, %v435_v32 }
 0x2ff   : > { %v385_v42 = vpop.xlane.xlu1 %384  ;;  %v437_v33 = vsel %vm436_vm12, %v434_v31, %v435_v32 }
 0x300   : > { %vm386_vm10 = vcmp.eq.f32.partialorder %v383_v36, %v385_v42  ;;  %v391_v62 = vcvt.f32.s32 %v385_v42  ;;  %v438_v34 = vrot.slane %v437_v33, 2 }
 0x301   : > { %v387_v44 = vsel %vm386_vm10, %v382_v43, inf }
 0x302   : > { %388 = vmin.xlane.f32.xlu1 %v387_v44  ;;  %v392_v2 = vshll.u32 %v391_v62, 16  ;;  %vm439_vm13 = vcmp.gt.s32.totalorder %v437_v33, %v438_v34 }
 0x303   : > { %v440_v35 = vsel %vm439_vm13, %v437_v33, %v438_v34 }
 0x304   : > { %v441_v36 = vrot.slane %v440_v35, 1 }
 0x306   : > { %vm442_vm14 = vcmp.gt.s32.totalorder %v440_v35, %v441_v36 }
 0x307   : > { %v443_v40 = vsel %vm442_vm14, %v440_v35, %v441_v36 }
 0x308   : > { %vm461_vm15 = vcmp.eq.s32.totalorder %v2036_v18, %v443_v40  ;;  %vm464_vm1 = vcmp.eq.s32.totalorder %v2034_v17, %v443_v40 }
 0x38b   : > { %v374_v61 = vpop.xlane.xlu0 %373 }
 0x38c   : > { %v375_v63 = vcvt.f32.s32 %v374_v61 }
 0x38e   : > { %v378_v3 = vadd.s32 %v377_v0, %v375_v63 }
 0x38f   : > { %v389_v1 = vpop.xlane.xlu1 %388 }
 0x390   : > { %v390_v5 = vcvt.f32.s32 %v389_v1  ;;  %v418_v7 = vsel %vm416_vm2, %v378_v3, 4294967295  ;;  %vm463_vm2 = vcmp.eq.s32.totalorder %v2031_v16, %v443_v40 }
 0x392   : > { %v393_v6 = vadd.s32 %v392_v2, %v390_v5 }
 0x394   : > { %v419_v8 = vsel %vm417_vm3, %v393_v6, 4294967295 }
 0x395   : > { %vm420_vm4 = vcmp.gt.s32.totalorder %v418_v7, %v419_v8 }
 0x396   : > { %v421_v9 = vsel %vm420_vm4, %v418_v7, %v419_v8 }
 0x397   : > { %v422_v10 = vrot.slane %v421_v9, 4 }
 0x399   : > { %vm423_vm6 = vcmp.gt.s32.totalorder %v421_v9, %v422_v10 }
 0x39a   : > { %v424_v11 = vsel %vm423_vm6, %v421_v9, %v422_v10 }
 0x39b   : > { %v425_v12 = vrot.slane %v424_v11, 2 }
 0x39d   : > { %vm426_vm7 = vcmp.gt.s32.totalorder %v424_v11, %v425_v12 }
 0x39e   : > { %v427_v13 = vsel %vm426_vm7, %v424_v11, %v425_v12 }
 0x39f   : > { %v428_v14 = vrot.slane %v427_v13, 1 }
 0x3a1   : > { %vm429_vm8 = vcmp.gt.s32.totalorder %v427_v13, %v428_v14 }
 0x3a2   : > { %v430_v15 = vsel %vm429_vm8, %v427_v13, %v428_v14 }
 0x3a3   : > { %vm444_vm9 = vcmp.eq.s32.totalorder %v2036_v18, %v430_v15 }
 0x3a4   : > { %v445_v19 = vsel %vm444_vm9, %v2036_v18, 4294967295 }
 0x3a5   : > { %v446_v20 = vsel %vm353_vm5, %v445_v19, 2147483648 }
 0x3a6   : > { %v448_v23 = vshra.s32 %v446_v20, 16  ;;  %v447_v25 = vand.u32 65535, %v446_v20 }
 0x3a8   : > { %v450_v24 = vcvt.s32.f32 %v448_v23  ;;  %v449_v27 = vcvt.s32.f32 %v447_v25 }
 0x3aa   : > { %451 = vmax.xlane.f32.xlu0 %v450_v24 }
 0x437   : > { %v452_v26 = vpop.xlane.xlu0 %451 }
 0x438   : > { %vm453_vm10 = vcmp.eq.f32.partialorder %v450_v24, %v452_v26  ;;  %v458_v37 = vcvt.f32.s32 %v452_v26 }
 0x439   : > { %v454_v28 = vsel %vm453_vm10, %v449_v27, -inf }
 0x43a   : > { %455 = vmax.xlane.f32.xlu1 %v454_v28  ;;  %v459_v39 = vshll.u32 %v458_v37, 16 }
 0x4c7   : > { %v456_v38 = vpop.xlane.xlu1 %455 }
 0x4c8   : > { %v457_v41 = vcvt.f32.s32 %v456_v38 }
 0x4ca   : > { %v460_v42 = vadd.s32 %v459_v39, %v457_v41 }
 0x4cc   : > { %v2079_v43 = vsel %vm461_vm15, %v460_v42, %v2036_v18  ;;  %v2082_v44 = vsel %vm464_vm1, %v460_v42, %v2034_v17  ;;  %v2085_v45 = vsel %vm463_vm2, %v460_v42, %v2031_v16 }
 0x4cd   : > { %vm468_vm3 = vcmp.ne.s32.totalorder %v2082_v44, %v2079_v43  ;;  %vm467_vm4 = vcmp.ne.s32.totalorder %v2085_v45, %v2079_v43 }
 0x4ce   : > { %v470_v46 = vsel %vm468_vm3, %v2044_v21, -1e+30  ;;  %v469_v47 = vsel %vm467_vm4, %v2046_v22, -1e+30 }
 0x4cf   : > { %v474_v48 = vsel %vm353_vm5, %v470_v46, -inf  ;;  %v471_v49 = vsel %vm353_vm5, %v469_v47, -inf }
 0x4d0   : > { %475 = vmax.xlane.f32.xlu1 %v474_v48  ;;  %472 = vmax.xlane.f32.xlu0 %v471_v49 }
 0x55d   : > { %v476_v50 = vpop.xlane.xlu1 %475  ;;  %v473_v51 = vpop.xlane.xlu0 %472 }
 0x55e   : > { %vm478_vm6 = vcmp.eq.f32.partialorder %v470_v46, %v476_v50  ;;  %vm477_vm7 = vcmp.eq.f32.partialorder %v469_v47, %v473_v51  ;;  %v511_v4 = vmax.f32 %v473_v51, %v476_v50 }
 0x55f   : > { %v480_v52 = vsel %vm478_vm6, %v2036_v18, 16  ;;  %v479_v53 = vsel %vm477_vm7, %v2036_v18, 16 }
 0x560   : > { %v496_v54 = vsel %vm353_vm5, %v480_v52, 2147483647  ;;  %v481_v55 = vsel %vm353_vm5, %v479_v53, 2147483647  ;;  %v512_v5 = vrot.slane %v511_v4, 4 }
 0x561   : > { %v498_v56 = vshra.s32 %v496_v54, 16  ;;  %v483_v57 = vshra.s32 %v481_v55, 16  ;;  %v497_v60 = vand.u32 65535, %v496_v54  ;;  %v482_v61 = vand.u32 65535, %v481_v55 }
 0x562   : > { %v513_v6 = vmax.f32 %v511_v4, %v512_v5 }
 0x563   : > { %v500_v58 = vcvt.s32.f32 %v498_v56  ;;  %v485_v59 = vcvt.s32.f32 %v483_v57  ;;  %v499_v0 = vcvt.s32.f32 %v497_v60  ;;  %v484_v1 = vcvt.s32.f32 %v482_v61 }
 0x564   : > { %v514_v7 = vrot.slane %v513_v6, 2 }
 0x565   : > { %501 = vmin.xlane.f32.xlu1 %v500_v58  ;;  %486 = vmin.xlane.f32.xlu0 %v485_v59 }
 0x566   : > { %v515_v8 = vmax.f32 %v513_v6, %v514_v7 }
 0x568   : > { %v516_v9 = vrot.slane %v515_v8, 1 }
 0x56a   : > { %v517_v10 = vmax.f32 %v515_v8, %v516_v9 }
 0x56c   : > { %vm518_vm10 = vcmp.eq.f32.partialorder %v473_v51, %v517_v10  ;;  %vm519_vm11 = vcmp.eq.f32.partialorder %v476_v50, %v517_v10 }
 0x56d   : > { %v520_v11 = vsel %vm518_vm10, %v2031_v16, 16  ;;  %v521_v12 = vsel %vm519_vm11, %v2034_v17, 16 }
 0x56e   : > { %vm522_vm12 = vcmp.lt.s32.totalorder %v520_v11, %v521_v12 }
 0x56f   : > { %v523_v13 = vsel %vm522_vm12, %v520_v11, %v521_v12 }
 0x570   : > { %v524_v14 = vrot.slane %v523_v13, 4 }
 0x572   : > { %vm525_vm13 = vcmp.lt.s32.totalorder %v523_v13, %v524_v14 }
 0x573   : > { %v526_v15 = vsel %vm525_vm13, %v523_v13, %v524_v14 }
 0x574   : > { %v527_v19 = vrot.slane %v526_v15, 2 }
 0x576   : > { %vm528_vm14 = vcmp.lt.s32.totalorder %v526_v15, %v527_v19 }
 0x577   : > { %v529_v20 = vsel %vm528_vm14, %v526_v15, %v527_v19 }
 0x578   : > { %v530_v23 = vrot.slane %v529_v20, 1 }
 0x57a   : > { %vm531_vm15 = vcmp.lt.s32.totalorder %v529_v20, %v530_v23 }
 0x57b   : > { %v532_v27 = vsel %vm531_vm15, %v529_v20, %v530_v23 }
 0x57c   : > { %vm534_vm1 = vcmp.eq.s32.totalorder %v2034_v17, %v532_v27  ;;  %vm533_vm2 = vcmp.eq.s32.totalorder %v2031_v16, %v532_v27 }
 0x57d   : > { %v549_v55 = vsel %vm534_vm1, %v2082_v44, 4294967295  ;;  %v548_v56 = vsel %vm533_vm2, %v2085_v45, 4294967295 }
 0x57e   : > { %vm550_vm10 = vcmp.gt.s32.totalorder %v548_v56, %v549_v55 }
 0x57f   : > { %v551_v57 = vsel %vm550_vm10, %v548_v56, %v549_v55 }
 0x5f2   : > { %v502_v62 = vpop.xlane.xlu1 %501  ;;  %v487_v63 = vpop.xlane.xlu0 %486 }
 0x5f3   : > { %vm503_vm8 = vcmp.eq.f32.partialorder %v500_v58, %v502_v62  ;;  %vm488_vm9 = vcmp.eq.f32.partialorder %v485_v59, %v487_v63  ;;  %v508_v24 = vcvt.f32.s32 %v502_v62  ;;  %v493_v25 = vcvt.f32.s32 %v487_v63 }
 0x5f4   : > { %v504_v2 = vsel %vm503_vm8, %v499_v0, inf  ;;  %v489_v3 = vsel %vm488_vm9, %v484_v1, inf  ;;  %v552_v58 = vrot.slane %v551_v57, 4 }
 0x5f5   : > { %505 = vmin.xlane.f32.xlu1 %v504_v2  ;;  %490 = vmin.xlane.f32.xlu0 %v489_v3  ;;  %v509_v29 = vshll.u32 %v508_v24, 16  ;;  %v494_v30 = vshll.u32 %v493_v25, 16 }
 0x5f6   : > { %vm553_vm11 = vcmp.gt.s32.totalorder %v551_v57, %v552_v58 }
 0x5f7   : > { %v554_v59 = vsel %vm553_vm11, %v551_v57, %v552_v58 }
 0x5f8   : > { %v555_v60 = vrot.slane %v554_v59, 2 }
 0x5fa   : > { %vm556_vm12 = vcmp.gt.s32.totalorder %v554_v59, %v555_v60 }
 0x5fb   : > { %v557_v61 = vsel %vm556_vm12, %v554_v59, %v555_v60 }
 0x5fc   : > { %v558_v62 = vrot.slane %v557_v61, 1 }
 0x5fe   : > { %vm559_vm13 = vcmp.gt.s32.totalorder %v557_v61, %v558_v62 }
 0x5ff   : > { %v560_v2 = vsel %vm559_vm13, %v557_v61, %v558_v62 }
 0x600   : > { %vm578_vm14 = vcmp.eq.s32.totalorder %v2079_v43, %v560_v2  ;;  %vm581_vm15 = vcmp.eq.s32.totalorder %v2082_v44, %v560_v2 }
 0x682   : > { %v506_v26 = vpop.xlane.xlu1 %505  ;;  %v491_v28 = vpop.xlane.xlu0 %490 }
 0x683   : > { %v507_v31 = vcvt.f32.s32 %v506_v26  ;;  %v492_v32 = vcvt.f32.s32 %v491_v28 }
 0x685   : > { %v510_v33 = vadd.s32 %v509_v29, %v507_v31  ;;  %v495_v34 = vadd.s32 %v494_v30, %v492_v32 }
 0x687   : > { %v536_v35 = vsel %vm534_vm1, %v510_v33, 4294967295  ;;  %v535_v36 = vsel %vm533_vm2, %v495_v34, 4294967295  ;;  %vm580_vm1 = vcmp.eq.s32.totalorder %v2085_v45, %v560_v2 }
 0x688   : > { %vm537_vm3 = vcmp.gt.s32.totalorder %v535_v36, %v536_v35 }
 0x689   : > { %v538_v37 = vsel %vm537_vm3, %v535_v36, %v536_v35 }
 0x68a   : > { %v539_v38 = vrot.slane %v538_v37, 4 }
 0x68c   : > { %vm540_vm4 = vcmp.gt.s32.totalorder %v538_v37, %v539_v38 }
 0x68d   : > { %v541_v39 = vsel %vm540_vm4, %v538_v37, %v539_v38 }
 0x68e   : > { %v542_v40 = vrot.slane %v541_v39, 2 }
 0x690   : > { %vm543_vm6 = vcmp.gt.s32.totalorder %v541_v39, %v542_v40 }
 0x691   : > { %v544_v41 = vsel %vm543_vm6, %v541_v39, %v542_v40 }
 0x692   : > { %v545_v42 = vrot.slane %v544_v41, 1 }
 0x694   : > { %vm546_vm7 = vcmp.gt.s32.totalorder %v544_v41, %v545_v42 }
 0x695   : > { %v547_v46 = vsel %vm546_vm7, %v544_v41, %v545_v42 }
 0x696   : > { %vm561_vm8 = vcmp.eq.s32.totalorder %v2036_v18, %v547_v46 }
 0x697   : > { %v562_v47 = vsel %vm561_vm8, %v2079_v43, 4294967295 }
 0x698   : > { %v563_v48 = vsel %vm353_vm5, %v562_v47, 2147483648 }
 0x699   : > { %v565_v49 = vshra.s32 %v563_v48, 16  ;;  %v564_v51 = vand.u32 65535, %v563_v48 }
 0x69b   : > { %v567_v50 = vcvt.s32.f32 %v565_v49  ;;  %v566_v53 = vcvt.s32.f32 %v564_v51 }
 0x69d   : > { %568 = vmax.xlane.f32.xlu0 %v567_v50 }
 0x72a   : > { %v569_v52 = vpop.xlane.xlu0 %568 }
 0x72b   : > { %vm570_vm9 = vcmp.eq.f32.partialorder %v567_v50, %v569_v52  ;;  %v575_v63 = vcvt.f32.s32 %v569_v52 }
 0x72c   : > { %v571_v54 = vsel %vm570_vm9, %v566_v53, -inf }
 0x72d   : > { %572 = vmax.xlane.f32.xlu1 %v571_v54  ;;  %v576_v1 = vshll.u32 %v575_v63, 16 }
 0x7ba   : > { %v573_v0 = vpop.xlane.xlu1 %572 }
 0x7bb   : > { %v574_v3 = vcvt.f32.s32 %v573_v0 }
 0x7bd   : > { %v577_v4 = vadd.s32 %v576_v1, %v574_v3 }
 0x7bf   : > { %v2120_v5 = vsel %vm578_vm14, %v577_v4, %v2079_v43  ;;  %v2123_v6 = vsel %vm581_vm15, %v577_v4, %v2082_v44  ;;  %v2126_v7 = vsel %vm580_vm1, %v577_v4, %v2085_v45 }
 0x7c0   : > { %vm585_vm2 = vcmp.ne.s32.totalorder %v2123_v6, %v2120_v5  ;;  %vm584_vm3 = vcmp.ne.s32.totalorder %v2126_v7, %v2120_v5 }
 0x7c1   : > { %v587_v8 = vsel %vm585_vm2, %v2044_v21, -1e+30  ;;  %v586_v9 = vsel %vm584_vm3, %v2046_v22, -1e+30 }
 0x7c2   : > { %v591_v10 = vsel %vm353_vm5, %v587_v8, -inf  ;;  %v588_v43 = vsel %vm353_vm5, %v586_v9, -inf }
 0x7c3   : > { %592 = vmax.xlane.f32.xlu1 %v591_v10  ;;  %589 = vmax.xlane.f32.xlu0 %v588_v43 }
 0x850   : > { %v593_v44 = vpop.xlane.xlu1 %592  ;;  %v590_v11 = vpop.xlane.xlu0 %589 }
 0x851   : > { %vm595_vm4 = vcmp.eq.f32.partialorder %v587_v8, %v593_v44  ;;  %vm594_vm6 = vcmp.eq.f32.partialorder %v586_v9, %v590_v11  ;;  %v628_v32 = vmax.f32 %v590_v11, %v593_v44 }
 0x852   : > { %v597_v45 = vsel %vm595_vm4, %v2036_v18, 16  ;;  %v596_v12 = vsel %vm594_vm6, %v2036_v18, 16 }
 0x853   : > { %v613_v13 = vsel %vm353_vm5, %v597_v45, 2147483647  ;;  %v598_v14 = vsel %vm353_vm5, %v596_v12, 2147483647  ;;  %v629_v33 = vrot.slane %v628_v32, 4 }
 0x854   : > { %v615_v15 = vshra.s32 %v613_v13, 16  ;;  %v600_v19 = vshra.s32 %v598_v14, 16  ;;  %v614_v24 = vand.u32 65535, %v613_v13  ;;  %v599_v25 = vand.u32 65535, %v598_v14 }
 0x855   : > { %v630_v34 = vmax.f32 %v628_v32, %v629_v33 }
 0x856   : > { %v617_v20 = vcvt.s32.f32 %v615_v15  ;;  %v602_v23 = vcvt.s32.f32 %v600_v19  ;;  %v616_v28 = vcvt.s32.f32 %v614_v24  ;;  %v601_v29 = vcvt.s32.f32 %v599_v25 }
 0x857   : > { %v631_v35 = vrot.slane %v630_v34, 2 }
 0x858   : > { %618 = vmin.xlane.f32.xlu1 %v617_v20  ;;  %603 = vmin.xlane.f32.xlu0 %v602_v23 }
 0x859   : > { %v632_v36 = vmax.f32 %v630_v34, %v631_v35 }
 0x85b   : > { %v633_v37 = vrot.slane %v632_v36, 1 }
 0x85d   : > { %v634_v38 = vmax.f32 %v632_v36, %v633_v37 }
 0x85f   : > { %vm635_vm9 = vcmp.eq.f32.partialorder %v590_v11, %v634_v38  ;;  %vm636_vm10 = vcmp.eq.f32.partialorder %v593_v44, %v634_v38 }
 0x860   : > { %v637_v39 = vsel %vm635_vm9, %v2031_v16, 16  ;;  %v638_v40 = vsel %vm636_vm10, %v2034_v17, 16 }
 0x861   : > { %vm639_vm11 = vcmp.lt.s32.totalorder %v637_v39, %v638_v40 }
 0x862   : > { %v640_v41 = vsel %vm639_vm11, %v637_v39, %v638_v40 }
 0x863   : > { %v641_v42 = vrot.slane %v640_v41, 4 }
 0x865   : > { %vm642_vm12 = vcmp.lt.s32.totalorder %v640_v41, %v641_v42 }
 0x866   : > { %v643_v46 = vsel %vm642_vm12, %v640_v41, %v641_v42 }
 0x867   : > { %v644_v47 = vrot.slane %v643_v46, 2 }
 0x869   : > { %vm645_vm13 = vcmp.lt.s32.totalorder %v643_v46, %v644_v47 }
 0x86a   : > { %v646_v48 = vsel %vm645_vm13, %v643_v46, %v644_v47 }
 0x86b   : > { %v647_v49 = vrot.slane %v646_v48, 1 }
 0x86d   : > { %vm648_vm14 = vcmp.lt.s32.totalorder %v646_v48, %v647_v49 }
 0x86e   : > { %v649_v53 = vsel %vm648_vm14, %v646_v48, %v647_v49 }
 0x86f   : > { %vm651_vm15 = vcmp.eq.s32.totalorder %v2034_v17, %v649_v53  ;;  %vm650_vm1 = vcmp.eq.s32.totalorder %v2031_v16, %v649_v53 }
 0x870   : > { %v666_v14 = vsel %vm651_vm15, %v2123_v6, 4294967295  ;;  %v665_v15 = vsel %vm650_vm1, %v2126_v7, 4294967295 }
 0x871   : > { %vm667_vm9 = vcmp.gt.s32.totalorder %v665_v15, %v666_v14 }
 0x872   : > { %v668_v19 = vsel %vm667_vm9, %v665_v15, %v666_v14 }
 0x8e5   : > { %v619_v26 = vpop.xlane.xlu1 %618  ;;  %v604_v27 = vpop.xlane.xlu0 %603 }
 0x8e6   : > { %vm620_vm7 = vcmp.eq.f32.partialorder %v617_v20, %v619_v26  ;;  %vm605_vm8 = vcmp.eq.f32.partialorder %v602_v23, %v604_v27  ;;  %v625_v50 = vcvt.f32.s32 %v619_v26  ;;  %v610_v51 = vcvt.f32.s32 %v604_v27 }
 0x8e7   : > { %v621_v30 = vsel %vm620_vm7, %v616_v28, inf  ;;  %v606_v31 = vsel %vm605_vm8, %v601_v29, inf  ;;  %v669_v20 = vrot.slane %v668_v19, 4 }
 0x8e8   : > { %622 = vmin.xlane.f32.xlu1 %v621_v30  ;;  %607 = vmin.xlane.f32.xlu0 %v606_v31  ;;  %v626_v55 = vshll.u32 %v625_v50, 16  ;;  %v611_v56 = vshll.u32 %v610_v51, 16 }
 0x8e9   : > { %vm670_vm10 = vcmp.gt.s32.totalorder %v668_v19, %v669_v20 }
 0x8ea   : > { %v671_v23 = vsel %vm670_vm10, %v668_v19, %v669_v20 }
 0x8eb   : > { %v672_v24 = vrot.slane %v671_v23, 2 }
 0x8ed   : > { %vm673_vm11 = vcmp.gt.s32.totalorder %v671_v23, %v672_v24 }
 0x8ee   : > { %v674_v25 = vsel %vm673_vm11, %v671_v23, %v672_v24 }
 0x8ef   : > { %v675_v26 = vrot.slane %v674_v25, 1 }
 0x8f1   : > { %vm676_vm12 = vcmp.gt.s32.totalorder %v674_v25, %v675_v26 }
 0x8f2   : > { %v677_v30 = vsel %vm676_vm12, %v674_v25, %v675_v26 }
 0x8f3   : > { %vm695_vm13 = vcmp.eq.s32.totalorder %v2120_v5, %v677_v30  ;;  %vm698_vm14 = vcmp.eq.s32.totalorder %v2123_v6, %v677_v30 }
 0x975   : > { %v623_v52 = vpop.xlane.xlu1 %622  ;;  %v608_v54 = vpop.xlane.xlu0 %607 }
 0x976   : > { %v624_v57 = vcvt.f32.s32 %v623_v52  ;;  %v609_v58 = vcvt.f32.s32 %v608_v54 }
 0x978   : > { %v627_v59 = vadd.s32 %v626_v55, %v624_v57  ;;  %v612_v60 = vadd.s32 %v611_v56, %v609_v58 }
 0x97a   : > { %v653_v61 = vsel %vm651_vm15, %v627_v59, 4294967295  ;;  %v652_v62 = vsel %vm650_vm1, %v612_v60, 4294967295  ;;  %vm697_vm15 = vcmp.eq.s32.totalorder %v2126_v7, %v677_v30 }
 0x97b   : > { %vm654_vm2 = vcmp.gt.s32.totalorder %v652_v62, %v653_v61 }
 0x97c   : > { %v655_v63 = vsel %vm654_vm2, %v652_v62, %v653_v61 }
 0x97d   : > { %v656_v0 = vrot.slane %v655_v63, 4 }
 0x97f   : > { %vm657_vm3 = vcmp.gt.s32.totalorder %v655_v63, %v656_v0 }
 0x980   : > { %v658_v1 = vsel %vm657_vm3, %v655_v63, %v656_v0 }
 0x981   : > { %v659_v2 = vrot.slane %v658_v1, 2 }
 0x983   : > { %vm660_vm4 = vcmp.gt.s32.totalorder %v658_v1, %v659_v2 }
 0x984   : > { %v661_v3 = vsel %vm660_vm4, %v658_v1, %v659_v2 }
 0x985   : > { %v662_v4 = vrot.slane %v661_v3, 1 }
 0x987   : > { %vm663_vm6 = vcmp.gt.s32.totalorder %v661_v3, %v662_v4 }
 0x988   : > { %v664_v8 = vsel %vm663_vm6, %v661_v3, %v662_v4 }
 0x989   : > { %vm678_vm7 = vcmp.eq.s32.totalorder %v2036_v18, %v664_v8 }
 0x98a   : > { %v679_v9 = vsel %vm678_vm7, %v2120_v5, 4294967295 }
 0x98b   : > { %v680_v10 = vsel %vm353_vm5, %v679_v9, 2147483648 }
 0x98c   : > { %v682_v43 = vshra.s32 %v680_v10, 16  ;;  %v681_v11 = vand.u32 65535, %v680_v10 }
 0x98e   : > { %v684_v44 = vcvt.s32.f32 %v682_v43  ;;  %v683_v12 = vcvt.s32.f32 %v681_v11 }
 0x990   : > { %685 = vmax.xlane.f32.xlu0 %v684_v44 }
 0xa1d   : > { %v686_v45 = vpop.xlane.xlu0 %685 }
 0xa1e   : > { %vm687_vm8 = vcmp.eq.f32.partialorder %v684_v44, %v686_v45  ;;  %v692_v27 = vcvt.f32.s32 %v686_v45 }
 0xa1f   : > { %v688_v13 = vsel %vm687_vm8, %v683_v12, -inf }
 0xa20   : > { %689 = vmax.xlane.f32.xlu1 %v688_v13  ;;  %v693_v29 = vshll.u32 %v692_v27, 16 }
 0xaad   : > { %v690_v28 = vpop.xlane.xlu1 %689 }
 0xaae   : > { %v691_v31 = vcvt.f32.s32 %v690_v28 }
 0xab0   : > { %v694_v32 = vadd.s32 %v693_v29, %v691_v31 }
 0xab2   : > { %v2161_v33 = vsel %vm695_vm13, %v694_v32, %v2120_v5  ;;  %v2164_v34 = vsel %vm698_vm14, %v694_v32, %v2123_v6  ;;  %v2167_v35 = vsel %vm697_vm15, %v694_v32, %v2126_v7 }
 0xab3   : > { %vm702_vm1 = vcmp.ne.s32.totalorder %v2164_v34, %v2161_v33  ;;  %vm701_vm2 = vcmp.ne.s32.totalorder %v2167_v35, %v2161_v33 }
 0xab4   : > { %v704_v36 = vsel %vm702_vm1, %v2044_v21, -1e+30  ;;  %v703_v37 = vsel %vm701_vm2, %v2046_v22, -1e+30 }
 0xab5   : > { %v708_v38 = vsel %vm353_vm5, %v704_v36, -inf  ;;  %v705_v5 = vsel %vm353_vm5, %v703_v37, -inf }
 0xab6   : > { %709 = vmax.xlane.f32.xlu1 %v708_v38  ;;  %706 = vmax.xlane.f32.xlu0 %v705_v5 }
 0xb43   : > { %v710_v6 = vpop.xlane.xlu1 %709  ;;  %v707_v39 = vpop.xlane.xlu0 %706 }
 0xb44   : > { %vm712_vm3 = vcmp.eq.f32.partialorder %v704_v36, %v710_v6  ;;  %vm711_vm4 = vcmp.eq.f32.partialorder %v703_v37, %v707_v39  ;;  %v745_v58 = vmax.f32 %v707_v39, %v710_v6 }
 0xb45   : > { %v714_v7 = vsel %vm712_vm3, %v2036_v18, 16  ;;  %v713_v40 = vsel %vm711_vm4, %v2036_v18, 16 }
 0xb46   : > { %v730_v41 = vsel %vm353_vm5, %v714_v7, 2147483647  ;;  %v715_v42 = vsel %vm353_vm5, %v713_v40, 2147483647  ;;  %v746_v59 = vrot.slane %v745_v58, 4 }
 0xb47   : > { %v732_v46 = vshra.s32 %v730_v41, 16  ;;  %v717_v47 = vshra.s32 %v715_v42, 16  ;;  %v731_v50 = vand.u32 65535, %v730_v41  ;;  %v716_v51 = vand.u32 65535, %v715_v42 }
 0xb48   : > { %v747_v60 = vmax.f32 %v745_v58, %v746_v59 }
 0xb49   : > { %v734_v48 = vcvt.s32.f32 %v732_v46  ;;  %v719_v49 = vcvt.s32.f32 %v717_v47  ;;  %v733_v54 = vcvt.s32.f32 %v731_v50  ;;  %v718_v55 = vcvt.s32.f32 %v716_v51 }
 0xb4a   : > { %v748_v61 = vrot.slane %v747_v60, 2 }
 0xb4b   : > { %735 = vmin.xlane.f32.xlu1 %v734_v48  ;;  %720 = vmin.xlane.f32.xlu0 %v719_v49 }
 0xb4c   : > { %v749_v62 = vmax.f32 %v747_v60, %v748_v61 }
 0xb4e   : > { %v750_v63 = vrot.slane %v749_v62, 1 }
 0xb50   : > { %v751_v0 = vmax.f32 %v749_v62, %v750_v63 }
 0xb52   : > { %vm752_vm8 = vcmp.eq.f32.partialorder %v707_v39, %v751_v0  ;;  %vm753_vm9 = vcmp.eq.f32.partialorder %v710_v6, %v751_v0 }
 0xb53   : > { %v754_v1 = vsel %vm752_vm8, %v2031_v16, 16  ;;  %v755_v2 = vsel %vm753_vm9, %v2034_v17, 16 }
 0xb54   : > { %vm756_vm10 = vcmp.lt.s32.totalorder %v754_v1, %v755_v2 }
 0xb55   : > { %v757_v3 = vsel %vm756_vm10, %v754_v1, %v755_v2 }
 0xb56   : > { %v758_v4 = vrot.slane %v757_v3, 4 }
 0xb58   : > { %vm759_vm11 = vcmp.lt.s32.totalorder %v757_v3, %v758_v4 }
 0xb59   : > { %v760_v8 = vsel %vm759_vm11, %v757_v3, %v758_v4 }
 0xb5a   : > { %v761_v9 = vrot.slane %v760_v8, 2 }
 0xb5c   : > { %vm762_vm12 = vcmp.lt.s32.totalorder %v760_v8, %v761_v9 }
 0xb5d   : > { %v763_v10 = vsel %vm762_vm12, %v760_v8, %v761_v9 }
 0xb5e   : > { %v764_v43 = vrot.slane %v763_v10, 1 }
 0xb60   : > { %vm765_vm13 = vcmp.lt.s32.totalorder %v763_v10, %v764_v43 }
 0xb61   : > { %v766_v12 = vsel %vm765_vm13, %v763_v10, %v764_v43 }
 0xb62   : > { %vm768_vm14 = vcmp.eq.s32.totalorder %v2034_v17, %v766_v12  ;;  %vm767_vm15 = vcmp.eq.s32.totalorder %v2031_v16, %v766_v12 }
 0xb63   : > { %v783_v42 = vsel %vm768_vm14, %v2164_v34, 4294967295  ;;  %v782_v46 = vsel %vm767_vm15, %v2167_v35, 4294967295 }
 0xb64   : > { %vm784_vm8 = vcmp.gt.s32.totalorder %v782_v46, %v783_v42 }
 0xb65   : > { %v785_v47 = vsel %vm784_vm8, %v782_v46, %v783_v42 }
 0xbd8   : > { %v736_v52 = vpop.xlane.xlu1 %735  ;;  %v721_v53 = vpop.xlane.xlu0 %720 }
 0xbd9   : > { %vm737_vm6 = vcmp.eq.f32.partialorder %v734_v48, %v736_v52  ;;  %vm722_vm7 = vcmp.eq.f32.partialorder %v719_v49, %v721_v53  ;;  %v742_v44 = vcvt.f32.s32 %v736_v52  ;;  %v727_v11 = vcvt.f32.s32 %v721_v53 }
 0xbda   : > { %v738_v56 = vsel %vm737_vm6, %v733_v54, inf  ;;  %v723_v57 = vsel %vm722_vm7, %v718_v55, inf  ;;  %v786_v48 = vrot.slane %v785_v47, 4 }
 0xbdb   : > { %739 = vmin.xlane.f32.xlu1 %v738_v56  ;;  %724 = vmin.xlane.f32.xlu0 %v723_v57  ;;  %v743_v14 = vshll.u32 %v742_v44, 16  ;;  %v728_v15 = vshll.u32 %v727_v11, 16 }
 0xbdc   : > { %vm787_vm9 = vcmp.gt.s32.totalorder %v785_v47, %v786_v48 }
 0xbdd   : > { %v788_v49 = vsel %vm787_vm9, %v785_v47, %v786_v48 }
 0xbde   : > { %v789_v50 = vrot.slane %v788_v49, 2 }
 0xbe0   : > { %vm790_vm10 = vcmp.gt.s32.totalorder %v788_v49, %v789_v50 }
 0xbe1   : > { %v791_v51 = vsel %vm790_vm10, %v788_v49, %v789_v50 }
 0xbe2   : > { %v792_v52 = vrot.slane %v791_v51, 1 }
 0xbe4   : > { %vm793_vm11 = vcmp.gt.s32.totalorder %v791_v51, %v792_v52 }
 0xbe5   : > { %v794_v56 = vsel %vm793_vm11, %v791_v51, %v792_v52 }
 0xbe6   : > { %vm812_vm12 = vcmp.eq.s32.totalorder %v2161_v33, %v794_v56  ;;  %vm815_vm13 = vcmp.eq.s32.totalorder %v2164_v34, %v794_v56 }
 0xc68   : > { %v740_v45 = vpop.xlane.xlu1 %739  ;;  %v725_v13 = vpop.xlane.xlu0 %724 }
 0xc69   : > { %v741_v19 = vcvt.f32.s32 %v740_v45  ;;  %v726_v20 = vcvt.f32.s32 %v725_v13 }
 0xc6b   : > { %v744_v23 = vadd.s32 %v743_v14, %v741_v19  ;;  %v729_v24 = vadd.s32 %v728_v15, %v726_v20 }
 0xc6d   : > { %v770_v25 = vsel %vm768_vm14, %v744_v23, 4294967295  ;;  %v769_v26 = vsel %vm767_vm15, %v729_v24, 4294967295  ;;  %vm814_vm14 = vcmp.eq.s32.totalorder %v2167_v35, %v794_v56 }
 0xc6e   : > { %vm771_vm1 = vcmp.gt.s32.totalorder %v769_v26, %v770_v25 }
 0xc6f   : > { %v772_v27 = vsel %vm771_vm1, %v769_v26, %v770_v25 }
 0xc70   : > { %v773_v28 = vrot.slane %v772_v27, 4 }
 0xc72   : > { %vm774_vm2 = vcmp.gt.s32.totalorder %v772_v27, %v773_v28 }
 0xc73   : > { %v775_v29 = vsel %vm774_vm2, %v772_v27, %v773_v28 }
 0xc74   : > { %v776_v30 = vrot.slane %v775_v29, 2 }
 0xc76   : > { %vm777_vm3 = vcmp.gt.s32.totalorder %v775_v29, %v776_v30 }
 0xc77   : > { %v778_v31 = vsel %vm777_vm3, %v775_v29, %v776_v30 }
 0xc78   : > { %v779_v32 = vrot.slane %v778_v31, 1 }
 0xc7a   : > { %vm780_vm4 = vcmp.gt.s32.totalorder %v778_v31, %v779_v32 }
 0xc7b   : > { %v781_v36 = vsel %vm780_vm4, %v778_v31, %v779_v32 }
 0xc7c   : > { %vm795_vm6 = vcmp.eq.s32.totalorder %v2036_v18, %v781_v36 }
 0xc7d   : > { %v796_v37 = vsel %vm795_vm6, %v2161_v33, 4294967295 }
 0xc7e   : > { %v797_v38 = vsel %vm353_vm5, %v796_v37, 2147483648 }
 0xc7f   : > { %v799_v5 = vshra.s32 %v797_v38, 16  ;;  %v798_v39 = vand.u32 65535, %v797_v38 }
 0xc81   : > { %v801_v6 = vcvt.s32.f32 %v799_v5  ;;  %v800_v40 = vcvt.s32.f32 %v798_v39 }
 0xc83   : > { %802 = vmax.xlane.f32.xlu0 %v801_v6 }
 0xd10   : > { %v803_v7 = vpop.xlane.xlu0 %802 }
 0xd11   : > { %vm804_vm7 = vcmp.eq.f32.partialorder %v801_v6, %v803_v7  ;;  %v809_v53 = vcvt.f32.s32 %v803_v7 }
 0xd12   : > { %v805_v41 = vsel %vm804_vm7, %v800_v40, -inf }
 0xd13   : > { %806 = vmax.xlane.f32.xlu1 %v805_v41  ;;  %v810_v55 = vshll.u32 %v809_v53, 16 }
 0xda0   : > { %v807_v54 = vpop.xlane.xlu1 %806 }
 0xda1   : > { %v808_v57 = vcvt.f32.s32 %v807_v54 }
 0xda3   : > { %v811_v58 = vadd.s32 %v810_v55, %v808_v57 }
 0xda5   : > { %v2202_v59 = vsel %vm812_vm12, %v811_v58, %v2161_v33  ;;  %v2205_v60 = vsel %vm815_vm13, %v811_v58, %v2164_v34  ;;  %v2208_v61 = vsel %vm814_vm14, %v811_v58, %v2167_v35 }
 0xda6   : > { %vm819_vm15 = vcmp.ne.s32.totalorder %v2205_v60, %v2202_v59  ;;  %vm818_vm1 = vcmp.ne.s32.totalorder %v2208_v61, %v2202_v59 }
 0xda7   : > { %v821_v62 = vsel %vm819_vm15, %v2044_v21, -1e+30  ;;  %v820_v63 = vsel %vm818_vm1, %v2046_v22, -1e+30 }
 0xda8   : > { %v825_v0 = vsel %vm353_vm5, %v821_v62, -inf  ;;  %v822_v33 = vsel %vm353_vm5, %v820_v63, -inf }
 0xda9   : > { %826 = vmax.xlane.f32.xlu1 %v825_v0  ;;  %823 = vmax.xlane.f32.xlu0 %v822_v33 }
 0xe36   : > { %v827_v34 = vpop.xlane.xlu1 %826  ;;  %v824_v1 = vpop.xlane.xlu0 %823 }
 0xe37   : > { %vm829_vm2 = vcmp.eq.f32.partialorder %v821_v62, %v827_v34  ;;  %vm828_vm3 = vcmp.eq.f32.partialorder %v820_v63, %v824_v1  ;;  %v862_v20 = vmax.f32 %v824_v1, %v827_v34 }
 0xe38   : > { %v831_v35 = vsel %vm829_vm2, %v2036_v18, 16  ;;  %v830_v2 = vsel %vm828_vm3, %v2036_v18, 16 }
 0xe39   : > { %v847_v3 = vsel %vm353_vm5, %v831_v35, 2147483647  ;;  %v832_v4 = vsel %vm353_vm5, %v830_v2, 2147483647  ;;  %v863_v23 = vrot.slane %v862_v20, 4 }
 0xe3a   : > { %v849_v8 = vshra.s32 %v847_v3, 16  ;;  %v834_v9 = vshra.s32 %v832_v4, 16  ;;  %v848_v44 = vand.u32 65535, %v847_v3  ;;  %v833_v11 = vand.u32 65535, %v832_v4 }
 0xe3b   : > { %v864_v24 = vmax.f32 %v862_v20, %v863_v23 }
 0xe3c   : > { %v851_v10 = vcvt.s32.f32 %v849_v8  ;;  %v836_v43 = vcvt.s32.f32 %v834_v9  ;;  %v850_v13 = vcvt.s32.f32 %v848_v44  ;;  %v835_v14 = vcvt.s32.f32 %v833_v11 }
 0xe3d   : > { %v865_v25 = vrot.slane %v864_v24, 2 }
 0xe3e   : > { %852 = vmin.xlane.f32.xlu1 %v851_v10  ;;  %837 = vmin.xlane.f32.xlu0 %v836_v43 }
 0xe3f   : > { %v866_v26 = vmax.f32 %v864_v24, %v865_v25 }
 0xe41   : > { %v867_v27 = vrot.slane %v866_v26, 1 }
 0xe43   : > { %v868_v28 = vmax.f32 %v866_v26, %v867_v27 }
 0xe45   : > { %vm869_vm7 = vcmp.eq.f32.partialorder %v824_v1, %v868_v28  ;;  %vm870_vm8 = vcmp.eq.f32.partialorder %v827_v34, %v868_v28 }
 0xe46   : > { %v871_v29 = vsel %vm869_vm7, %v2031_v16, 16  ;;  %v872_v30 = vsel %vm870_vm8, %v2034_v17, 16 }
 0xe47   : > { %vm873_vm9 = vcmp.lt.s32.totalorder %v871_v29, %v872_v30 }
 0xe48   : > { %v874_v31 = vsel %vm873_vm9, %v871_v29, %v872_v30 }
 0xe49   : > { %v875_v32 = vrot.slane %v874_v31, 4 }
 0xe4b   : > { %vm876_vm10 = vcmp.lt.s32.totalorder %v874_v31, %v875_v32 }
 0xe4c   : > { %v877_v36 = vsel %vm876_vm10, %v874_v31, %v875_v32 }
 0xe4d   : > { %v878_v37 = vrot.slane %v877_v36, 2 }
 0xe4f   : > { %vm879_vm11 = vcmp.lt.s32.totalorder %v877_v36, %v878_v37 }
 0xe50   : > { %v880_v38 = vsel %vm879_vm11, %v877_v36, %v878_v37 }
 0xe51   : > { %v881_v5 = vrot.slane %v880_v38, 1 }
 0xe53   : > { %vm882_vm12 = vcmp.lt.s32.totalorder %v880_v38, %v881_v5 }
 0xe54   : > { %v883_v40 = vsel %vm882_vm12, %v880_v38, %v881_v5 }
 0xe55   : > { %vm885_vm13 = vcmp.eq.s32.totalorder %v2034_v17, %v883_v40  ;;  %vm884_vm14 = vcmp.eq.s32.totalorder %v2031_v16, %v883_v40 }
 0xe56   : > { %v900_v4 = vsel %vm885_vm13, %v2205_v60, 4294967295  ;;  %v899_v8 = vsel %vm884_vm14, %v2208_v61, 4294967295 }
 0xe57   : > { %vm901_vm7 = vcmp.gt.s32.totalorder %v899_v8, %v900_v4 }
 0xe58   : > { %v902_v9 = vsel %vm901_vm7, %v899_v8, %v900_v4 }
 0xecb   : > { %v853_v45 = vpop.xlane.xlu1 %852  ;;  %v838_v12 = vpop.xlane.xlu0 %837 }
 0xecc   : > { %vm854_vm4 = vcmp.eq.f32.partialorder %v851_v10, %v853_v45  ;;  %vm839_vm6 = vcmp.eq.f32.partialorder %v836_v43, %v838_v12  ;;  %v859_v6 = vcvt.f32.s32 %v853_v45  ;;  %v844_v39 = vcvt.f32.s32 %v838_v12 }
 0xecd   : > { %v855_v15 = vsel %vm854_vm4, %v850_v13, inf  ;;  %v840_v19 = vsel %vm839_vm6, %v835_v14, inf  ;;  %v903_v10 = vrot.slane %v902_v9, 4 }
 0xece   : > { %856 = vmin.xlane.f32.xlu1 %v855_v15  ;;  %841 = vmin.xlane.f32.xlu0 %v840_v19  ;;  %v860_v42 = vshll.u32 %v859_v6, 16  ;;  %v845_v46 = vshll.u32 %v844_v39, 16 }
 0xecf   : > { %vm904_vm8 = vcmp.gt.s32.totalorder %v902_v9, %v903_v10 }
 0xed0   : > { %v905_v43 = vsel %vm904_vm8, %v902_v9, %v903_v10 }
 0xed1   : > { %v906_v44 = vrot.slane %v905_v43, 2 }
 0xed3   : > { %vm907_vm9 = vcmp.gt.s32.totalorder %v905_v43, %v906_v44 }
 0xed4   : > { %v908_v11 = vsel %vm907_vm9, %v905_v43, %v906_v44 }
 0xed5   : > { %v909_v45 = vrot.slane %v908_v11, 1 }
 0xed7   : > { %vm910_vm10 = vcmp.gt.s32.totalorder %v908_v11, %v909_v45 }
 0xed8   : > { %v911_v15 = vsel %vm910_vm10, %v908_v11, %v909_v45 }
 0xed9   : > { %vm929_vm11 = vcmp.eq.s32.totalorder %v2202_v59, %v911_v15  ;;  %vm932_vm12 = vcmp.eq.s32.totalorder %v2205_v60, %v911_v15 }
 0xf5b   : > { %v857_v7 = vpop.xlane.xlu1 %856  ;;  %v842_v41 = vpop.xlane.xlu0 %841 }
 0xf5c   : > { %v858_v47 = vcvt.f32.s32 %v857_v7  ;;  %v843_v48 = vcvt.f32.s32 %v842_v41 }
 0xf5e   : > { %v861_v49 = vadd.s32 %v860_v42, %v858_v47  ;;  %v846_v50 = vadd.s32 %v845_v46, %v843_v48 }
 0xf60   : > { %v887_v51 = vsel %vm885_vm13, %v861_v49, 4294967295  ;;  %v886_v52 = vsel %vm884_vm14, %v846_v50, 4294967295  ;;  %vm931_vm13 = vcmp.eq.s32.totalorder %v2208_v61, %v911_v15 }
 0xf61   : > { %vm888_vm15 = vcmp.gt.s32.totalorder %v886_v52, %v887_v51 }
 0xf62   : > { %v889_v53 = vsel %vm888_vm15, %v886_v52, %v887_v51 }
 0xf63   : > { %v890_v54 = vrot.slane %v889_v53, 4 }
 0xf65   : > { %vm891_vm1 = vcmp.gt.s32.totalorder %v889_v53, %v890_v54 }
 0xf66   : > { %v892_v55 = vsel %vm891_vm1, %v889_v53, %v890_v54 }
 0xf67   : > { %v893_v56 = vrot.slane %v892_v55, 2 }
 0xf69   : > { %vm894_vm2 = vcmp.gt.s32.totalorder %v892_v55, %v893_v56 }
 0xf6a   : > { %v895_v57 = vsel %vm894_vm2, %v892_v55, %v893_v56 }
 0xf6b   : > { %v896_v58 = vrot.slane %v895_v57, 1 }
 0xf6d   : > { %vm897_vm3 = vcmp.gt.s32.totalorder %v895_v57, %v896_v58 }
 0xf6e   : > { %v898_v62 = vsel %vm897_vm3, %v895_v57, %v896_v58 }
 0xf6f   : > { %vm912_vm4 = vcmp.eq.s32.totalorder %v2036_v18, %v898_v62 }
 0xf70   : > { %v913_v63 = vsel %vm912_vm4, %v2202_v59, 4294967295 }
 0xf71   : > { %v914_v0 = vsel %vm353_vm5, %v913_v63, 2147483648 }
 0xf72   : > { %v916_v33 = vshra.s32 %v914_v0, 16  ;;  %v915_v1 = vand.u32 65535, %v914_v0 }
 0xf74   : > { %v918_v34 = vcvt.s32.f32 %v916_v33  ;;  %v917_v2 = vcvt.s32.f32 %v915_v1 }
 0xf76   : > { %919 = vmax.xlane.f32.xlu0 %v918_v34 }
0x1003   : > { %v920_v35 = vpop.xlane.xlu0 %919 }
0x1004   : > { %vm921_vm6 = vcmp.eq.f32.partialorder %v918_v34, %v920_v35  ;;  %v926_v12 = vcvt.f32.s32 %v920_v35 }
0x1005   : > { %v922_v3 = vsel %vm921_vm6, %v917_v2, -inf }
0x1006   : > { %923 = vmax.xlane.f32.xlu1 %v922_v3  ;;  %v927_v14 = vshll.u32 %v926_v12, 16 }
0x1093   : > { %v924_v13 = vpop.xlane.xlu1 %923 }
0x1094   : > { %v925_v19 = vcvt.f32.s32 %v924_v13 }
0x1096   : > { %v928_v20 = vadd.s32 %v927_v14, %v925_v19 }
0x1098   : > { %v2243_v23 = vsel %vm929_vm11, %v928_v20, %v2202_v59  ;;  %v2246_v24 = vsel %vm932_vm12, %v928_v20, %v2205_v60  ;;  %v2249_v25 = vsel %vm931_vm13, %v928_v20, %v2208_v61 }
0x1099   : > { %vm936_vm14 = vcmp.ne.s32.totalorder %v2246_v24, %v2243_v23  ;;  %vm935_vm15 = vcmp.ne.s32.totalorder %v2249_v25, %v2243_v23 }
0x109a   : > { %v938_v26 = vsel %vm936_vm14, %v2044_v21, -1e+30  ;;  %v937_v27 = vsel %vm935_vm15, %v2046_v22, -1e+30 }
0x109b   : > { %v942_v28 = vsel %vm353_vm5, %v938_v26, -inf  ;;  %v939_v59 = vsel %vm353_vm5, %v937_v27, -inf }
0x109c   : > { %943 = vmax.xlane.f32.xlu1 %v942_v28  ;;  %940 = vmax.xlane.f32.xlu0 %v939_v59 }
0x1129   : > { %v944_v60 = vpop.xlane.xlu1 %943  ;;  %v941_v29 = vpop.xlane.xlu0 %940 }
0x112a   : > { %vm946_vm1 = vcmp.eq.f32.partialorder %v938_v26, %v944_v60  ;;  %vm945_vm2 = vcmp.eq.f32.partialorder %v937_v27, %v941_v29  ;;  %v979_v48 = vmax.f32 %v941_v29, %v944_v60 }
0x112b   : > { %v948_v61 = vsel %vm946_vm1, %v2036_v18, 16  ;;  %v947_v30 = vsel %vm945_vm2, %v2036_v18, 16 }
0x112c   : > { %v964_v31 = vsel %vm353_vm5, %v948_v61, 2147483647  ;;  %v949_v32 = vsel %vm353_vm5, %v947_v30, 2147483647  ;;  %v980_v49 = vrot.slane %v979_v48, 4 }
0x112d   : > { %v966_v36 = vshra.s32 %v964_v31, 16  ;;  %v951_v37 = vshra.s32 %v949_v32, 16  ;;  %v965_v6 = vand.u32 65535, %v964_v31  ;;  %v950_v39 = vand.u32 65535, %v949_v32 }
0x112e   : > { %v981_v50 = vmax.f32 %v979_v48, %v980_v49 }
0x112f   : > { %v968_v38 = vcvt.s32.f32 %v966_v36  ;;  %v953_v5 = vcvt.s32.f32 %v951_v37  ;;  %v967_v41 = vcvt.s32.f32 %v965_v6  ;;  %v952_v42 = vcvt.s32.f32 %v950_v39 }
0x1130   : > { %v982_v51 = vrot.slane %v981_v50, 2 }
0x1131   : > { %969 = vmin.xlane.f32.xlu1 %v968_v38  ;;  %954 = vmin.xlane.f32.xlu0 %v953_v5 }
0x1132   : > { %v983_v52 = vmax.f32 %v981_v50, %v982_v51 }
0x1134   : > { %v984_v53 = vrot.slane %v983_v52, 1 }
0x1136   : > { %v985_v54 = vmax.f32 %v983_v52, %v984_v53 }
0x1138   : > { %vm986_vm6 = vcmp.eq.f32.partialorder %v941_v29, %v985_v54  ;;  %vm987_vm7 = vcmp.eq.f32.partialorder %v944_v60, %v985_v54 }
0x1139   : > { %v988_v55 = vsel %vm986_vm6, %v2031_v16, 16  ;;  %v989_v56 = vsel %vm987_vm7, %v2034_v17, 16 }
0x113a   : > { %vm990_vm8 = vcmp.lt.s32.totalorder %v988_v55, %v989_v56 }
0x113b   : > { %v991_v57 = vsel %vm990_vm8, %v988_v55, %v989_v56 }
0x113c   : > { %v992_v58 = vrot.slane %v991_v57, 4 }
0x113e   : > { %vm993_vm9 = vcmp.lt.s32.totalorder %v991_v57, %v992_v58 }
0x113f   : > { %v994_v62 = vsel %vm993_vm9, %v991_v57, %v992_v58 }
0x1140   : > { %v995_v63 = vrot.slane %v994_v62, 2 }
0x1142   : > { %vm996_vm10 = vcmp.lt.s32.totalorder %v994_v62, %v995_v63 }
0x1143   : > { %v997_v0 = vsel %vm996_vm10, %v994_v62, %v995_v63 }
0x1144   : > { %v998_v33 = vrot.slane %v997_v0, 1 }
0x1146   : > { %vm999_vm11 = vcmp.lt.s32.totalorder %v997_v0, %v998_v33 }
0x1147   : > { %v1000_v2 = vsel %vm999_vm11, %v997_v0, %v998_v33 }
0x1148   : > { %vm1002_vm12 = vcmp.eq.s32.totalorder %v2034_v17, %v1000_v2  ;;  %vm1001_vm13 = vcmp.eq.s32.totalorder %v2031_v16, %v1000_v2 }
0x1149   : > { %v1017_v32 = vsel %vm1002_vm12, %v2246_v24, 4294967295  ;;  %v1016_v36 = vsel %vm1001_vm13, %v2249_v25, 4294967295 }
0x114a   : > { %vm1018_vm6 = vcmp.gt.s32.totalorder %v1016_v36, %v1017_v32 }
0x114b   : > { %v1019_v37 = vsel %vm1018_vm6, %v1016_v36, %v1017_v32 }
0x11be   : > { %v970_v7 = vpop.xlane.xlu1 %969  ;;  %v955_v40 = vpop.xlane.xlu0 %954 }
0x11bf   : > { %vm971_vm3 = vcmp.eq.f32.partialorder %v968_v38, %v970_v7  ;;  %vm956_vm4 = vcmp.eq.f32.partialorder %v953_v5, %v955_v40  ;;  %v976_v34 = vcvt.f32.s32 %v970_v7  ;;  %v961_v1 = vcvt.f32.s32 %v955_v40 }
0x11c0   : > { %v972_v46 = vsel %vm971_vm3, %v967_v41, inf  ;;  %v957_v47 = vsel %vm956_vm4, %v952_v42, inf  ;;  %v1020_v38 = vrot.slane %v1019_v37, 4 }
0x11c1   : > { %973 = vmin.xlane.f32.xlu1 %v972_v46  ;;  %958 = vmin.xlane.f32.xlu0 %v957_v47  ;;  %v977_v4 = vshll.u32 %v976_v34, 16  ;;  %v962_v8 = vshll.u32 %v961_v1, 16 }
0x11c2   : > { %vm1021_vm7 = vcmp.gt.s32.totalorder %v1019_v37, %v1020_v38 }
0x11c3   : > { %v1022_v5 = vsel %vm1021_vm7, %v1019_v37, %v1020_v38 }
0x11c4   : > { %v1023_v6 = vrot.slane %v1022_v5, 2 }
0x11c6   : > { %vm1024_vm8 = vcmp.gt.s32.totalorder %v1022_v5, %v1023_v6 }
0x11c7   : > { %v1025_v39 = vsel %vm1024_vm8, %v1022_v5, %v1023_v6 }
0x11c8   : > { %v1026_v7 = vrot.slane %v1025_v39, 1 }
0x11ca   : > { %vm1027_vm9 = vcmp.gt.s32.totalorder %v1025_v39, %v1026_v7 }
0x11cb   : > { %v1028_v46 = vsel %vm1027_vm9, %v1025_v39, %v1026_v7 }
0x11cc   : > { %vm1046_vm10 = vcmp.eq.s32.totalorder %v2243_v23, %v1028_v46  ;;  %vm1049_vm11 = vcmp.eq.s32.totalorder %v2246_v24, %v1028_v46 }
0x124e   : > { %v974_v35 = vpop.xlane.xlu1 %973  ;;  %v959_v3 = vpop.xlane.xlu0 %958 }
0x124f   : > { %v975_v9 = vcvt.f32.s32 %v974_v35  ;;  %v960_v10 = vcvt.f32.s32 %v959_v3 }
0x1251   : > { %v978_v43 = vadd.s32 %v977_v4, %v975_v9  ;;  %v963_v44 = vadd.s32 %v962_v8, %v960_v10 }
0x1253   : > { %v1004_v11 = vsel %vm1002_vm12, %v978_v43, 4294967295  ;;  %v1003_v45 = vsel %vm1001_vm13, %v963_v44, 4294967295  ;;  %vm1048_vm12 = vcmp.eq.s32.totalorder %v2249_v25, %v1028_v46 }
0x1254   : > { %vm1005_vm14 = vcmp.gt.s32.totalorder %v1003_v45, %v1004_v11 }
0x1255   : > { %v1006_v12 = vsel %vm1005_vm14, %v1003_v45, %v1004_v11 }
0x1256   : > { %v1007_v13 = vrot.slane %v1006_v12, 4 }
0x1258   : > { %vm1008_vm15 = vcmp.gt.s32.totalorder %v1006_v12, %v1007_v13 }
0x1259   : > { %v1009_v14 = vsel %vm1008_vm15, %v1006_v12, %v1007_v13 }
0x125a   : > { %v1010_v15 = vrot.slane %v1009_v14, 2 }
0x125c   : > { %vm1011_vm1 = vcmp.gt.s32.totalorder %v1009_v14, %v1010_v15 }
0x125d   : > { %v1012_v19 = vsel %vm1011_vm1, %v1009_v14, %v1010_v15 }
0x125e   : > { %v1013_v20 = vrot.slane %v1012_v19, 1 }
0x1260   : > { %vm1014_vm2 = vcmp.gt.s32.totalorder %v1012_v19, %v1013_v20 }
0x1261   : > { %v1015_v26 = vsel %vm1014_vm2, %v1012_v19, %v1013_v20 }
0x1262   : > { %vm1029_vm3 = vcmp.eq.s32.totalorder %v2036_v18, %v1015_v26 }
0x1263   : > { %v1030_v27 = vsel %vm1029_vm3, %v2243_v23, 4294967295 }
0x1264   : > { %v1031_v28 = vsel %vm353_vm5, %v1030_v27, 2147483648 }
0x1265   : > { %v1033_v59 = vshra.s32 %v1031_v28, 16  ;;  %v1032_v29 = vand.u32 65535, %v1031_v28 }
0x1267   : > { %v1035_v60 = vcvt.s32.f32 %v1033_v59  ;;  %v1034_v30 = vcvt.s32.f32 %v1032_v29 }
0x1269   : > { %1036 = vmax.xlane.f32.xlu0 %v1035_v60 }
0x12f6   : > { %v1037_v61 = vpop.xlane.xlu0 %1036 }
0x12f7   : > { %vm1038_vm4 = vcmp.eq.f32.partialorder %v1035_v60, %v1037_v61  ;;  %v1043_v40 = vcvt.f32.s32 %v1037_v61 }
0x12f8   : > { %v1039_v31 = vsel %vm1038_vm4, %v1034_v30, -inf }
0x12f9   : > { %1040 = vmax.xlane.f32.xlu1 %v1039_v31  ;;  %v1044_v42 = vshll.u32 %v1043_v40, 16 }
0x1386   : > { %v1041_v41 = vpop.xlane.xlu1 %1040 }
0x1387   : > { %v1042_v47 = vcvt.f32.s32 %v1041_v41 }
0x1389   : > { %v1045_v48 = vadd.s32 %v1044_v42, %v1042_v47 }
0x138b   : > { %v2284_v49 = vsel %vm1046_vm10, %v1045_v48, %v2243_v23  ;;  %v2287_v50 = vsel %vm1049_vm11, %v1045_v48, %v2246_v24  ;;  %v2290_v51 = vsel %vm1048_vm12, %v1045_v48, %v2249_v25 }
0x138c   : > { %vm1053_vm13 = vcmp.ne.s32.totalorder %v2287_v50, %v2284_v49  ;;  %vm1052_vm14 = vcmp.ne.s32.totalorder %v2290_v51, %v2284_v49 }
0x138d   : > { %v1055_v52 = vsel %vm1053_vm13, %v2044_v21, -1e+30  ;;  %v1054_v53 = vsel %vm1052_vm14, %v2046_v22, -1e+30 }
0x138e   : > { %v1059_v54 = vsel %vm353_vm5, %v1055_v52, -inf  ;;  %v1056_v23 = vsel %vm353_vm5, %v1054_v53, -inf }
0x138f   : > { %1060 = vmax.xlane.f32.xlu1 %v1059_v54  ;;  %1057 = vmax.xlane.f32.xlu0 %v1056_v23 }
0x141c   : > { %v1061_v24 = vpop.xlane.xlu1 %1060  ;;  %v1058_v55 = vpop.xlane.xlu0 %1057 }
0x141d   : > { %vm1063_vm15 = vcmp.eq.f32.partialorder %v1055_v52, %v1061_v24  ;;  %vm1062_vm1 = vcmp.eq.f32.partialorder %v1054_v53, %v1058_v55  ;;  %v1096_v10 = vmax.f32 %v1058_v55, %v1061_v24 }
0x141e   : > { %v1065_v25 = vsel %vm1063_vm15, %v2036_v18, 16  ;;  %v1064_v56 = vsel %vm1062_vm1, %v2036_v18, 16 }
0x141f   : > { %v1081_v57 = vsel %vm353_vm5, %v1065_v25, 2147483647  ;;  %v1066_v58 = vsel %vm353_vm5, %v1064_v56, 2147483647  ;;  %v1097_v43 = vrot.slane %v1096_v10, 4 }
0x1420   : > { %v1083_v62 = vshra.s32 %v1081_v57, 16  ;;  %v1068_v63 = vshra.s32 %v1066_v58, 16  ;;  %v1082_v34 = vand.u32 65535, %v1081_v57  ;;  %v1067_v1 = vand.u32 65535, %v1066_v58 }
0x1421   : > { %v1098_v44 = vmax.f32 %v1096_v10, %v1097_v43 }
0x1422   : > { %v1085_v0 = vcvt.s32.f32 %v1083_v62  ;;  %v1070_v33 = vcvt.s32.f32 %v1068_v63  ;;  %v1084_v3 = vcvt.s32.f32 %v1082_v34  ;;  %v1069_v4 = vcvt.s32.f32 %v1067_v1 }
0x1423   : > { %v1099_v11 = vrot.slane %v1098_v44, 2 }
0x1424   : > { %1086 = vmin.xlane.f32.xlu1 %v1085_v0  ;;  %1071 = vmin.xlane.f32.xlu0 %v1070_v33 }
0x1425   : > { %v1100_v45 = vmax.f32 %v1098_v44, %v1099_v11 }
0x1427   : > { %v1101_v12 = vrot.slane %v1100_v45, 1 }
0x1429   : > { %v1102_v13 = vmax.f32 %v1100_v45, %v1101_v12 }
0x142b   : > { %vm1103_vm4 = vcmp.eq.f32.partialorder %v1058_v55, %v1102_v13  ;;  %vm1104_vm6 = vcmp.eq.f32.partialorder %v1061_v24, %v1102_v13 }
0x142c   : > { %v1105_v14 = vsel %vm1103_vm4, %v2031_v16, 16  ;;  %v1106_v15 = vsel %vm1104_vm6, %v2034_v17, 16 }
0x142d   : > { %vm1107_vm7 = vcmp.lt.s32.totalorder %v1105_v14, %v1106_v15 }
0x142e   : > { %v1108_v19 = vsel %vm1107_vm7, %v1105_v14, %v1106_v15 }
0x142f   : > { %v1109_v20 = vrot.slane %v1108_v19, 4 }
0x1431   : > { %vm1110_vm8 = vcmp.lt.s32.totalorder %v1108_v19, %v1109_v20 }
0x1432   : > { %v1111_v26 = vsel %vm1110_vm8, %v1108_v19, %v1109_v20 }
0x1433   : > { %v1112_v27 = vrot.slane %v1111_v26, 2 }
0x1435   : > { %vm1113_vm9 = vcmp.lt.s32.totalorder %v1111_v26, %v1112_v27 }
0x1436   : > { %v1114_v28 = vsel %vm1113_vm9, %v1111_v26, %v1112_v27 }
0x1437   : > { %v1115_v59 = vrot.slane %v1114_v28, 1 }
0x1439   : > { %vm1116_vm10 = vcmp.lt.s32.totalorder %v1114_v28, %v1115_v59 }
0x143a   : > { %v1117_v30 = vsel %vm1116_vm10, %v1114_v28, %v1115_v59 }
0x143b   : > { %vm1119_vm11 = vcmp.eq.s32.totalorder %v2034_v17, %v1117_v30  ;;  %vm1118_vm12 = vcmp.eq.s32.totalorder %v2031_v16, %v1117_v30 }
0x143c   : > { %v1134_v58 = vsel %vm1119_vm11, %v2287_v50, 4294967295  ;;  %v1133_v62 = vsel %vm1118_vm12, %v2290_v51, 4294967295 }
0x143d   : > { %vm1135_vm4 = vcmp.gt.s32.totalorder %v1133_v62, %v1134_v58 }
0x143e   : > { %v1136_v63 = vsel %vm1135_vm4, %v1133_v62, %v1134_v58 }
0x14b1   : > { %v1087_v35 = vpop.xlane.xlu1 %1086  ;;  %v1072_v2 = vpop.xlane.xlu0 %1071 }
0x14b2   : > { %vm1088_vm2 = vcmp.eq.f32.partialorder %v1085_v0, %v1087_v35  ;;  %vm1073_vm3 = vcmp.eq.f32.partialorder %v1070_v33, %v1072_v2  ;;  %v1093_v60 = vcvt.f32.s32 %v1087_v35  ;;  %v1078_v29 = vcvt.f32.s32 %v1072_v2 }
0x14b3   : > { %v1089_v8 = vsel %vm1088_vm2, %v1084_v3, inf  ;;  %v1074_v9 = vsel %vm1073_vm3, %v1069_v4, inf  ;;  %v1137_v0 = vrot.slane %v1136_v63, 4 }
0x14b4   : > { %1090 = vmin.xlane.f32.xlu1 %v1089_v8  ;;  %1075 = vmin.xlane.f32.xlu0 %v1074_v9  ;;  %v1094_v32 = vshll.u32 %v1093_v60, 16  ;;  %v1079_v36 = vshll.u32 %v1078_v29, 16 }
0x14b5   : > { %vm1138_vm6 = vcmp.gt.s32.totalorder %v1136_v63, %v1137_v0 }
0x14b6   : > { %v1139_v33 = vsel %vm1138_vm6, %v1136_v63, %v1137_v0 }
0x14b7   : > { %v1140_v34 = vrot.slane %v1139_v33, 2 }
0x14b9   : > { %vm1141_vm7 = vcmp.gt.s32.totalorder %v1139_v33, %v1140_v34 }
0x14ba   : > { %v1142_v1 = vsel %vm1141_vm7, %v1139_v33, %v1140_v34 }
0x14bb   : > { %v1143_v35 = vrot.slane %v1142_v1, 1 }
0x14bd   : > { %vm1144_vm8 = vcmp.gt.s32.totalorder %v1142_v1, %v1143_v35 }
0x14be   : > { %v1145_v8 = vsel %vm1144_vm8, %v1142_v1, %v1143_v35 }
0x14bf   : > { %vm1163_vm9 = vcmp.eq.s32.totalorder %v2284_v49, %v1145_v8  ;;  %vm1166_vm10 = vcmp.eq.s32.totalorder %v2287_v50, %v1145_v8 }
0x1541   : > { %v1091_v61 = vpop.xlane.xlu1 %1090  ;;  %v1076_v31 = vpop.xlane.xlu0 %1075 }
0x1542   : > { %v1092_v37 = vcvt.f32.s32 %v1091_v61  ;;  %v1077_v38 = vcvt.f32.s32 %v1076_v31 }
0x1544   : > { %v1095_v5 = vadd.s32 %v1094_v32, %v1092_v37  ;;  %v1080_v6 = vadd.s32 %v1079_v36, %v1077_v38 }
0x1546   : > { %v1121_v39 = vsel %vm1119_vm11, %v1095_v5, 4294967295  ;;  %v1120_v7 = vsel %vm1118_vm12, %v1080_v6, 4294967295  ;;  %vm1165_vm11 = vcmp.eq.s32.totalorder %v2290_v51, %v1145_v8 }
0x1547   : > { %vm1122_vm13 = vcmp.gt.s32.totalorder %v1120_v7, %v1121_v39 }
0x1548   : > { %v1123_v40 = vsel %vm1122_vm13, %v1120_v7, %v1121_v39 }
0x1549   : > { %v1124_v41 = vrot.slane %v1123_v40, 4 }
0x154b   : > { %vm1125_vm14 = vcmp.gt.s32.totalorder %v1123_v40, %v1124_v41 }
0x154c   : > { %v1126_v42 = vsel %vm1125_vm14, %v1123_v40, %v1124_v41 }
0x154d   : > { %v1127_v46 = vrot.slane %v1126_v42, 2 }
0x154f   : > { %vm1128_vm15 = vcmp.gt.s32.totalorder %v1126_v42, %v1127_v46 }
0x1550   : > { %v1129_v47 = vsel %vm1128_vm15, %v1126_v42, %v1127_v46 }
0x1551   : > { %v1130_v48 = vrot.slane %v1129_v47, 1 }
0x1553   : > { %vm1131_vm1 = vcmp.gt.s32.totalorder %v1129_v47, %v1130_v48 }
0x1554   : > { %v1132_v52 = vsel %vm1131_vm1, %v1129_v47, %v1130_v48 }
0x1555   : > { %vm1146_vm2 = vcmp.eq.s32.totalorder %v2036_v18, %v1132_v52 }
0x1556   : > { %v1147_v53 = vsel %vm1146_vm2, %v2284_v49, 4294967295 }
0x1557   : > { %v1148_v54 = vsel %vm353_vm5, %v1147_v53, 2147483648 }
0x1558   : > { %v1150_v23 = vshra.s32 %v1148_v54, 16  ;;  %v1149_v55 = vand.u32 65535, %v1148_v54 }
0x155a   : > { %v1152_v24 = vcvt.s32.f32 %v1150_v23  ;;  %v1151_v56 = vcvt.s32.f32 %v1149_v55 }
0x155c   : > { %1153 = vmax.xlane.f32.xlu0 %v1152_v24 }
0x15e9   : > { %v1154_v25 = vpop.xlane.xlu0 %1153 }
0x15ea   : > { %vm1155_vm3 = vcmp.eq.f32.partialorder %v1152_v24, %v1154_v25  ;;  %v1160_v2 = vcvt.f32.s32 %v1154_v25 }
0x15eb   : > { %v1156_v57 = vsel %vm1155_vm3, %v1151_v56, -inf }
0x15ec   : > { %1157 = vmax.xlane.f32.xlu1 %v1156_v57  ;;  %v1161_v4 = vshll.u32 %v1160_v2, 16 }
0x1679   : > { %v1158_v3 = vpop.xlane.xlu1 %1157 }
0x167a   : > { %v1159_v9 = vcvt.f32.s32 %v1158_v3 }
0x167c   : > { %v1162_v10 = vadd.s32 %v1161_v4, %v1159_v9 }
0x167e   : > { %v2325_v43 = vsel %vm1163_vm9, %v1162_v10, %v2284_v49  ;;  %v2328_v44 = vsel %vm1166_vm10, %v1162_v10, %v2287_v50  ;;  %v2331_v11 = vsel %vm1165_vm11, %v1162_v10, %v2290_v51 }
0x167f   : > { %vm1170_vm12 = vcmp.ne.s32.totalorder %v2328_v44, %v2325_v43  ;;  %vm1169_vm13 = vcmp.ne.s32.totalorder %v2331_v11, %v2325_v43 }
0x1680   : > { %v1172_v45 = vsel %vm1170_vm12, %v2044_v21, -1e+30  ;;  %v1171_v12 = vsel %vm1169_vm13, %v2046_v22, -1e+30 }
0x1681   : > { %v1176_v13 = vsel %vm353_vm5, %v1172_v45, -inf  ;;  %v1173_v49 = vsel %vm353_vm5, %v1171_v12, -inf }
0x1682   : > { %1177 = vmax.xlane.f32.xlu1 %v1176_v13  ;;  %1174 = vmax.xlane.f32.xlu0 %v1173_v49 }
0x170f   : > { %v1178_v50 = vpop.xlane.xlu1 %1177  ;;  %v1175_v14 = vpop.xlane.xlu0 %1174 }
0x1710   : > { %vm1180_vm14 = vcmp.eq.f32.partialorder %v1172_v45, %v1178_v50  ;;  %vm1179_vm15 = vcmp.eq.f32.partialorder %v1171_v12, %v1175_v14  ;;  %v1213_v36 = vmax.f32 %v1175_v14, %v1178_v50 }
0x1711   : > { %v1182_v51 = vsel %vm1180_vm14, %v2036_v18, 16  ;;  %v1181_v15 = vsel %vm1179_vm15, %v2036_v18, 16 }
0x1712   : > { %v1198_v19 = vsel %vm353_vm5, %v1182_v51, 2147483647  ;;  %v1183_v21 = vsel %vm353_vm5, %v1181_v15, 2147483647  ;;  %v1214_v37 = vrot.slane %v1213_v36, 4 }
0x1713   : > { %v1200_v20 = vshra.s32 %v1198_v19, 16  ;;  %v1185_v22 = vshra.s32 %v1183_v21, 16  ;;  %v1199_v28 = vand.u32 65535, %v1198_v19  ;;  %v1184_v59 = vand.u32 65535, %v1183_v21 }
0x1714   : > { %v1215_v38 = vmax.f32 %v1213_v36, %v1214_v37  ;;  %v1826_v37 = vmov 0.0  }
0x1715   : > { %v1202_v26 = vcvt.s32.f32 %v1200_v20  ;;  %v1187_v27 = vcvt.s32.f32 %v1185_v22  ;;  %v1201_v61 = vcvt.s32.f32 %v1199_v28  ;;  %v1186_v30 = vcvt.s32.f32 %v1184_v59 }
0x1716   : > { %v1216_v5 = vrot.slane %v1215_v38, 2 }
0x1717   : > { %1203 = vmin.xlane.f32.xlu1 %v1202_v26  ;;  %1188 = vmin.xlane.f32.xlu0 %v1187_v27 }
0x1718   : > { %v1217_v6 = vmax.f32 %v1215_v38, %v1216_v5 }
0x171a   : > { %v1218_v39 = vrot.slane %v1217_v6, 1 }
0x171c   : > { %v1219_v7 = vmax.f32 %v1217_v6, %v1218_v39 }
0x171e   : > { %vm1220_vm3 = vcmp.eq.f32.partialorder %v1175_v14, %v1219_v7  ;;  %vm1221_vm4 = vcmp.eq.f32.partialorder %v1178_v50, %v1219_v7 }
0x171f   : > { %v1222_v40 = vsel %vm1220_vm3, %v2031_v16, 16  ;;  %v1223_v41 = vsel %vm1221_vm4, %v2034_v17, 16 }
0x1720   : > { %vm1224_vm6 = vcmp.lt.s32.totalorder %v1222_v40, %v1223_v41 }
0x1721   : > { %v1225_v42 = vsel %vm1224_vm6, %v1222_v40, %v1223_v41  ;;  %v242_v41 = vld [vmem:[%s2019_s9] sm:$0xff] }
0x1722   : > { %v1226_v46 = vrot.slane %v1225_v42, 4 }
0x1724   : > { %vm1227_vm7 = vcmp.lt.s32.totalorder %v1225_v42, %v1226_v46 }
0x1725   : > { %v1228_v47 = vsel %vm1227_vm7, %v1225_v42, %v1226_v46  ;;  %v243_v42 = vld [vmem:[%s2019_s9 + $0x8] sm:$0xff]  ;;  %v1827_v46 = vmov 0.0|0.0  }
0x1726   : > { %v1229_v48 = vrot.slane %v1228_v47, 2  ;;  %1623 = vmatprep.subr.bf16.mxu1 %v1827_v46 }
0x1728   : > { %vm1230_vm8 = vcmp.lt.s32.totalorder %v1228_v47, %v1229_v48 }
0x1729   : > { %v1231_v52 = vsel %vm1230_vm8, %v1228_v47, %v1229_v48  ;;  %v1624_v47 = vpack.c.bf16 %v243_v42, %v242_v41 }
0x172a   : > { %v1232_v53 = vrot.slane %v1231_v52, 1 }
0x172b   : > { %1625 = vmatpush3.bf16.msra.mxu1 %v1624_v47 }
0x172c   : > { %vm1233_vm9 = vcmp.lt.s32.totalorder %v1231_v52, %v1232_v53 }
0x172d   : > { %v1234_v55 = vsel %vm1233_vm9, %v1231_v52, %v1232_v53 }
0x172e   : > { %vm1236_vm10 = vcmp.eq.s32.totalorder %v2034_v17, %v1234_v55  ;;  %vm1235_vm11 = vcmp.eq.s32.totalorder %v2031_v16, %v1234_v55 }
0x172f   : > { %v1251_v15 = vsel %vm1236_vm10, %v2328_v44, 4294967295 }
0x17a4   : > { %v1204_v60 = vpop.xlane.xlu1 %1203  ;;  %v1189_v29 = vpop.xlane.xlu0 %1188 }
0x17a5   : > { %vm1205_vm1 = vcmp.eq.f32.partialorder %v1202_v26, %v1204_v60  ;;  %vm1190_vm2 = vcmp.eq.f32.partialorder %v1187_v27, %v1189_v29  ;;  %v1210_v54 = vcvt.f32.s32 %v1204_v60  ;;  %v1195_v23 = vcvt.f32.s32 %v1189_v29 }
0x17a6   : > { %v1206_v31 = vsel %vm1205_vm1, %v1201_v61, inf  ;;  %v1191_v32 = vsel %vm1190_vm2, %v1186_v30, inf }
0x17a7   : > { %1207 = vmin.xlane.f32.xlu1 %v1206_v31  ;;  %1192 = vmin.xlane.f32.xlu0 %v1191_v32  ;;  %v1211_v56 = vshll.u32 %v1210_v54, 16  ;;  %v1196_v57 = vshll.u32 %v1195_v23, 16 }
0x1834   : > { %v1208_v24 = vpop.xlane.xlu1 %1207  ;;  %v1193_v25 = vpop.xlane.xlu0 %1192 }
0x1835   : > { %v1209_v58 = vcvt.f32.s32 %v1208_v24  ;;  %v1194_v62 = vcvt.f32.s32 %v1193_v25 }
0x1837   : > { %v1212_v63 = vadd.s32 %v1211_v56, %v1209_v58  ;;  %v1197_v0 = vadd.s32 %v1196_v57, %v1194_v62 }
0x1839   : > { %v1238_v33 = vsel %vm1236_vm10, %v1212_v63, 4294967295  ;;  %v1237_v34 = vsel %vm1235_vm11, %v1197_v0, 4294967295 }
0x183a   : > { %vm1239_vm12 = vcmp.gt.s32.totalorder %v1237_v34, %v1238_v33 }
0x183b   : > { %v1240_v1 = vsel %vm1239_vm12, %v1237_v34, %v1238_v33 }
0x183c   : > { %v1241_v35 = vrot.slane %v1240_v1, 4 }
0x183e   : > { %vm1242_vm13 = vcmp.gt.s32.totalorder %v1240_v1, %v1241_v35 }
0x183f   : > { %v1243_v2 = vsel %vm1242_vm13, %v1240_v1, %v1241_v35 }
0x1840   : > { %v1244_v3 = vrot.slane %v1243_v2, 2 }
0x1842   : > { %vm1245_vm14 = vcmp.gt.s32.totalorder %v1243_v2, %v1244_v3 }
0x1843   : > { %v1246_v4 = vsel %vm1245_vm14, %v1243_v2, %v1244_v3 }
0x1844   : > { %v1247_v8 = vrot.slane %v1246_v4, 1 }
0x1846   : > { %vm1248_vm15 = vcmp.gt.s32.totalorder %v1246_v4, %v1247_v8 }
0x1847   : > { %v1249_v9 = vsel %vm1248_vm15, %v1246_v4, %v1247_v8  ;;  %vm1828_vm15 = vmmov 0  }
0x1848   : > { %vm1263_vm1 = vcmp.eq.s32.totalorder %v2036_v18, %v1249_v9  ;;  %v1250_v18 = vsel %vm1235_vm11, %v2331_v11, 4294967295  ;;  %1614 = vmatprep.mubr.msk.f32.mxu1 %vm1828_vm15, %v1826_v37 }
0x1849   : > { %v1264_v10 = vsel %vm1263_vm1, %v2325_v43, 4294967295  ;;  %vm1252_vm3 = vcmp.gt.s32.totalorder %v1250_v18, %v1251_v15 }
0x184a   : > { %v1265_v45 = vsel %vm353_vm5, %v1264_v10, 2147483648  ;;  %v1253_v19 = vsel %vm1252_vm3, %v1250_v18, %v1251_v15 }
0x184b   : > { %v1267_v12 = vshra.s32 %v1265_v45, 16  ;;  %v1266_v49 = vand.u32 65535, %v1265_v45  ;;  %v1254_v21 = vrot.slane %v1253_v19, 4 }
0x184d   : > { %v1269_v13 = vcvt.s32.f32 %v1267_v12  ;;  %v1268_v14 = vcvt.s32.f32 %v1266_v49  ;;  %vm1255_vm4 = vcmp.gt.s32.totalorder %v1253_v19, %v1254_v21 }
0x184e   : > { %v1256_v20 = vsel %vm1255_vm4, %v1253_v19, %v1254_v21 }
0x184f   : > { %1270 = vmax.xlane.f32.xlu0 %v1269_v13  ;;  %v1257_v22 = vrot.slane %v1256_v20, 2 }
0x1851   : > { %vm1258_vm6 = vcmp.gt.s32.totalorder %v1256_v20, %v1257_v22 }
0x1852   : > { %v1259_v26 = vsel %vm1258_vm6, %v1256_v20, %v1257_v22 }
0x1853   : > { %v1260_v27 = vrot.slane %v1259_v26, 1 }
0x1855   : > { %vm1261_vm7 = vcmp.gt.s32.totalorder %v1259_v26, %v1260_v27 }
0x1856   : > { %v1262_v29 = vsel %vm1261_vm7, %v1259_v26, %v1260_v27  ;;  %vm1421_vm7 = vcmask 7168  }
0x1857   : > { %vm1280_vm8 = vcmp.eq.s32.totalorder %v2325_v43, %v1262_v29  ;;  %vm1282_vm9 = vcmp.eq.s32.totalorder %v2331_v11, %v1262_v29  ;;  %vm1283_vm10 = vcmp.eq.s32.totalorder %v2328_v44, %v1262_v29 }
0x18dc   : > { %v1271_v50 = vpop.xlane.xlu0 %1270 }
0x18dd   : > { %vm1272_vm2 = vcmp.eq.f32.partialorder %v1269_v13, %v1271_v50  ;;  %v1277_v28 = vcvt.f32.s32 %v1271_v50 }
0x18de   : > { %v1273_v51 = vsel %vm1272_vm2, %v1268_v14, -inf }
0x18df   : > { %1274 = vmax.xlane.f32.xlu1 %v1273_v51  ;;  %v1278_v60 = vshll.u32 %v1277_v28, 16 }
0x196c   : > { %v1275_v59 = vpop.xlane.xlu1 %1274 }
0x196d   : > { %v1276_v61 = vcvt.f32.s32 %v1275_v59 }
0x196f   : > { %v1279_v30 = vadd.s32 %v1278_v60, %v1276_v61 }
0x1971   : > { %v1281_v31 = vsel %vm1280_vm8, %v1279_v30, %v2325_v43  ;;  %v1284_v32 = vsel %vm1282_vm9, %v1279_v30, %v2331_v11  ;;  %v1285_v36 = vsel %vm1283_vm10, %v1279_v30, %v2328_v44 }
0x1972   : > { %vm1286_vm11 = vcmp.eq.s32.totalorder %v1284_v32, %v1281_v31  ;;  %vm1287_vm12 = vcmp.eq.s32.totalorder %v1285_v36, %v1281_v31  ;;  %vm1302_vm13 = vcmp.eq.s32.totalorder %v2034_v17, %v1281_v31  ;;  %vm1301_vm14 = vcmp.eq.s32.totalorder %v2031_v16, %v1281_v31 }
0x1973   : > { %v1579_v38 = vsel %vm1286_vm11, 1.0, %v1826_v37  ;;  %v1580_v5 = vsel %vm1287_vm12, 1.0, %v1826_v37  ;;  %v1582_v6 = vsel %vm1302_vm13, 1.0, %v1826_v37  ;;  %v1581_v39 = vsel %vm1301_vm14, 1.0, %v1826_v37 }
0x1974   : > { %v1292_v7 = vsel %vm353_vm5, %v1579_v38, 0.0  ;;  %v1293_v43 = vsel %vm353_vm5, %v1580_v5, 0.0  ;;  %v1310_v11 = vsel %vm353_vm5, %v1582_v6, 0.0  ;;  %v1307_v44 = vsel %vm353_vm5, %v1581_v39, 0.0 }
0x1975   : > { %v1294_v40 = vadd.f32 %v1293_v43, %v1292_v7  ;;  %1311 = vadd.xlane.f32.xlu1 %v1310_v11  ;;  %1308 = vadd.xlane.f32.xlu0 %v1307_v44  ;;  %vm1320_vm1 = vcmp.le.s32.totalorder %v2034_v17, %v1281_v31  ;;  %vm1319_vm2 = vcmp.le.s32.totalorder %v2031_v16, %v1281_v31 }
0x1976   : > { %v1586_v24 = vsel %vm1320_vm1, 1.0, %v1826_v37  ;;  %v1585_v25 = vsel %vm1319_vm2, 1.0, %v1826_v37 }
0x1977   : > { %v1295_v48 = vrot.slane %v1294_v40, 4 }
0x1979   : > { %v1296_v52 = vadd.f32 %v1295_v48, %v1294_v40 }
0x197b   : > { %v1297_v23 = vrot.slane %v1296_v52, 2 }
0x197d   : > { %v1298_v62 = vadd.f32 %v1297_v23, %v1296_v52 }
0x197f   : > { %v1299_v34 = vrot.slane %v1298_v62, 1 }
0x1981   : > { %v1300_v2 = vadd.f32 %v1299_v34, %v1298_v62 }
0x1983   : > { %1688 = vrcp.f32 %v1300_v2 }
0x198d   : > { %v1689_v12 = vpop.eup %1688 }
0x1a02   : > { %v1312_v53 = vpop.xlane.xlu1 %1311  ;;  %v1309_v54 = vpop.xlane.xlu0 %1308 }
0x1a03   : > { %vm1314_vm3 = vcmp.gt.f32.partialorder %v1312_v53, 0.0  ;;  %vm1313_vm4 = vcmp.gt.f32.partialorder %v1309_v54, 0.0 }
0x1a04   : > { %v1584_v55 = vsel %vm1314_vm3, 1.0, %v1826_v37  ;;  %v1583_v56 = vsel %vm1313_vm4, 1.0, %v1826_v37 }
0x1a05   : > { %v1326_v57 = vmul.f32 %v1586_v24, %v1584_v55  ;;  %v1325_v58 = vmul.f32 %v1585_v25, %v1583_v56 }
0x1a07   : > { %v1328_v63 = vsel %vm353_vm5, %v1326_v57, 0.0  ;;  %v1327_v0 = vsel %vm353_vm5, %v1325_v58, 0.0 }
0x1a08   : > { %v1329_v33 = vadd.f32 %v1328_v63, %v1327_v0 }
0x1a0a   : > { %v1330_v17 = vrot.slane %v1329_v33, 4 }
0x1a0c   : > { %v1331_v1 = vadd.f32 %v1330_v17, %v1329_v33 }
0x1a0e   : > { %v1332_v35 = vrot.slane %v1331_v1, 2 }
0x1a10   : > { %v1333_v3 = vadd.f32 %v1332_v35, %v1331_v1 }
0x1a12   : > { %v1334_v4 = vrot.slane %v1333_v3, 1 }
0x1a14   : > { %v1335_v8 = vadd.f32 %v1334_v4, %v1333_v3 }
0x1a16   : > { %v1587_v9 = vadd.f32 -1.0, %v1335_v8 }
0x1a18   : > { %v1626_v10 = vtrunc.f32 %v1587_v9 }
0x1a1a   : > { %v1627_v45 = vcvt.f32.s32 %v1626_v10 }
0x1a1c   : > { %vm1338_vm6 = vcmp.eq.s32.totalorder %v2031_v16, %v1627_v45 }
0x1a1d   : > { %v1588_v13 = vsel %vm1338_vm6, 1.0, %v1826_v37 }
0x1a1e   : > { %v1417_v49 = vsel %vm353_vm5, %v1588_v13, 0.0  ;;  %v1343_v50 = vmul.f32 %v1689_v12, %v1588_v13 }
0x1a1f   : > { %1418 = vadd.xlane.f32.xlu0 %v1417_v49 }
0x1a20   : > { %1615 = vmatmul.mubr.msk.f32.vlgmr.msra.gmra.mrb[0].mxu1 %vm353_vm5, %v1343_v50 }
0x1aac   : > { %v1419_v14 = vpop.xlane.xlu0 %1418 }
0x1aad   : > { %1422 = vst.msk [vmem:[%s239_s29] sm:$0xff] %vm1421_vm7, %v1419_v14 }
0x1af3   : > { %v1413_v16 = vpop.f32.mrb[0].mxu1 }
0x1af4   : > { %1420 = vst.msk [vmem:[%s229_s17] sm:$0xff] %vm246_vm0, %v1413_v16  ;;  %v1616_v51 = vpop.f32.mrb[1].mxu1 }
0x1af5   : > { %1763 = shalt.err (!%p1760_p3)
}
0x1af6   : > { %s1764_s6 = scalar_lea.hbm %s2393_s8, 128  ;;  %s1768_s10 = scalar_lea.hbm %s2440_s2, 256 }
0x1af7   : > { %p1765_p8 = scmp.ne.s32.totalorder %s2393_s8, %s1764_s6  ;;  %p1769_p4 = scmp.lt.u32.totalorder %s2393_s8, %s2440_s2 }
0x1af8   : > { %p1770_p6 = scmp.lt.u32.totalorder %s1768_s10, %s1764_s6  ;;  %p1772_p1 = scmp.lt.u32.totalorder %s1764_s6, %s2393_s8 }
0x1af9   : > { %p1766_p0 = pnand %p1765_p8, %p2451_p12 }
0x1afa   : > { %p1771_p13 = por %p1770_p6, %p1769_p4 }
0x1afb   : > { %p1767_p2 = pneg %p1766_p0 }
0x1afc   : > { %p1773_p10 = por %p1772_p1, %p1771_p13 }
0x1afe   : > { %p1774_p5 = pnand %p1773_p10, %p1767_p2 }
0x1b00   : > { %1777 = shalt.err (!%p1774_p5)
}
0x1b01   : > { %1632 = dma.vmem_to_hbm [thread:$0]  (%p2451_p12), %s2395_s28, 128, %s2393_s8, %s1424_s30  }
0x1b02 PF: > { %s1456_s29 = sand.u32 1, %s1808_s12   ;;  %p2452_p7 = scmp.ne.s32.totalorder %s2447_s25, 0 }
0x1b03   : > { %p2453_p9 = scmp.ge.s32.totalorder %s1820_s15, 2  ;;  %s1457_s4 = scalar_lea.sflag [#allocation4], %s1456_s29 }
0x1b05   : > { %p1642_p11 = pnand %p2453_p9, %p2452_p7 }
0x1b07   : > { %1803 = dma.done.wait (!%p1642_p11), %s1457_s4, 128  }
0x1b08   : > { %1805 = vsyncadd (!%p1642_p11), %s1457_s4, 4294967168  ;;  %p20_p3 = scmp.ge.s32.totalorder %s1875_s18, 4   ;;  %s2454_s12 = smov %s1812_s13 }
0x1b09   : > { %s2455_s13 = smov %s1816_s14  ;;  %s2456_s14 = smov %s1887_s21 }
0x1b0a   : > { %s2457_s15 = smov %s1875_s18  ;;  %22 = sbr.rel (!%p20_p3) target bundleno = 7 (0x7), region = 98 }
0x1b11   :  { %1469 = vsyncpa [#allocation3], 1 }
0x1b12   :  { %1471 = vsyncpa [#allocation3 + $0x1], 1 }
0x1b13   :  { %1472 = vsyncpa [#allocation6], 1 }
0x1b14   :  { %1474 = vsyncpa [#allocation6 + $0x1], 1 }
0x1b15   :  { %1475 = vsyncpa [#allocation4], 1 }
0x1b16   :  { %1477 = vsyncpa [#allocation4 + $0x1], 1 }

</bundles_post_ra>
